<compile_context>
chip_gen: v7x
topology: tpu7x:2x2x1
jax: 0.10.0
libtpu: 0.0.40
codegen_flags: <defaults>
</compile_context>

<pallas_src>
import math
import numpy as np
import jax
import jax.numpy as jnp
from jax.experimental import pallas as pl
from jax.experimental.pallas import tpu as pltpu

# ----- dimensions -------------------------------------------------------------
B = 2              # batch
D = 32             # args.embed_dim
H = 4              # args.decoder_attention_heads
HD = D // H        # head_dim
F = 64             # args.decoder_ffn_dim
S = 8              # kg encoder source length
BH = B * H         # flattened batch*heads rows
BS = B * S         # flattened kg rows
LANES = 128
EPS = 1e-5         # nn.LayerNorm default eps
SCALING = HD ** -0.5
GELU_C = math.sqrt(2.0 / math.pi)

# ----- activation slab row layout (rows, 128 lanes), f32 ------------------------
A_KG = 0                 # kg_enc flattened (B*S, D) in lanes 0:D
A_PACK = BS              # [ctype | cent | kg_gate_in | up_gate_in]  (B, 128)
A_HS = BS + B            # hs_gru (B, D) in lanes 0:D
ACT_ROWS = BS + 2 * B    # 20

# ----- packed parameter slab row layout (rows, 2*D lanes), bf16 -----------------
R_WKGHS = 0               # stacked kg_hs weight (2D, D)
R_WV = 64                 # packed v_proj [type|entity]      (D, 2D)
R_WO = 96                 # block-diag out_proj              (2D, 2D)
R_WQ = 160                # cross-attn q_proj                (D, D)
R_WKV = 192               # packed cross-attn [k|v]          (D, 2D)
R_WOC = 224               # cross-attn out_proj              (D, D)
R_FC1 = 256               # (D, F)
R_FC2 = 288               # (F, D)
R_SEGT8 = 352             # per-(batch,head) head-lane mask  (BH, D)
R_XMASK = 360             # cross-batch score mask 0/-1e9    (BH, BS)
R_G0 = 368                # kg-gate weight [type|entity]     (1, 2D)
R_G1K, R_G1H = 369, 370   # fusion-gate weight halves        (1, D) each
R_B_KGHS, R_B_V, R_B_O, R_B_Q = 371, 372, 373, 374
R_B_KV, R_B_OC, R_B_FC1, R_B_FC2 = 375, 376, 377, 378
R_LNG, R_LNB = 379, 384   # 5 rows each
R_SCAL = 389              # col 0: kg-gate bias, col 1: fusion-gate bias
PSLAB_ROWS = 392


# ----- Pallas kernel ------------------------------------------------------------
def decoder_layer_kernel(acts_ref, p_ref, out_ref):
  f32 = jnp.float32

  def w(r, nr, nc):                      # static bf16 weight slice -> f32
    return p_ref[r:r + nr, 0:nc].astype(f32)

  def vrow(r, n):                        # (1, n) bias / vector row -> f32
    return p_ref[r:r + 1, 0:n].astype(f32)

  def layer_norm(x, idx):
    g = vrow(R_LNG + idx, D)
    b = vrow(R_LNB + idx, D)
    # E[x^2] - mu^2: both reductions can issue back-to-back (shorter XLU chain).
    mu = jnp.mean(x, axis=-1, keepdims=True)
    ex2 = jnp.mean(x * x, axis=-1, keepdims=True)
    var = ex2 - mu * mu
    return (x - mu) * jax.lax.rsqrt(var + EPS) * g + b

  def gelu(x):                           # tanh-approx gelu (reference `gelu`)
    return 0.5 * x * (1.0 + jnp.tanh(GELU_C * (x + 0.044715 * x * x * x)))

  kg_flat = acts_ref[A_KG:A_KG + BS, 0:D]          # (B*S, D)
  packed = acts_ref[A_PACK:A_PACK + B, :]          # (B, 128) = [ct|ce|kg|up]
  ctype = packed[:, 0:D]
  cent = packed[:, D:2 * D]
  kg_in = packed[:, 2 * D:3 * D]
  up_in = packed[:, 3 * D:4 * D]
  hs_gru = acts_ref[A_HS:A_HS + B, 0:D]

  # --- Norm_FusionGate (kg_gate_layer): one lane-masked mul + one reduce over
  #     the packed [ctype|cent] lanes --------------------------------------------
  g0 = jax.nn.sigmoid(
      jnp.sum(packed[:, 0:2 * D] * vrow(R_G0, 2 * D), axis=-1, keepdims=True)
      + p_ref[R_SCAL:R_SCAL + 1, 0:1].astype(f32))
  kg_gate_out = g0 * kg_in + (1.0 - g0) * up_in

  # --- kg_hs: single fused (B, 2D) x (2D, D) matmul + sigmoid + LN ---------------
  ctx_in = jnp.concatenate([hs_gru, kg_gate_out], axis=1)            # (B, 2D)
  ctx = (jnp.dot(ctx_in, w(R_WKGHS, 2 * D, D), preferred_element_type=f32)
         + vrow(R_B_KGHS, D))
  context = layer_norm(jax.nn.sigmoid(ctx), 0)

  # --- type/entity context attentions: 1-key softmax == 1, so they reduce to
  #     out_proj(v_proj(context)); both branches share two packed matmuls. -------
  v_pk = (jnp.dot(context, w(R_WV, D, 2 * D), preferred_element_type=f32)
          + vrow(R_B_V, 2 * D))                                      # (B, 2D)
  o_pk = (jnp.dot(v_pk, w(R_WO, 2 * D, 2 * D), preferred_element_type=f32)
          + vrow(R_B_O, 2 * D))                                      # (B, 2D)
  t = layer_norm(ctype + o_pk[:, 0:D], 1)
  e = layer_norm(cent + o_pk[:, D:2 * D], 2)

  # --- cross attention over kg encoder states: batch*heads flattened into
  #     sublanes -> single MXU passes (no batched einsums) -----------------------
  q = (jnp.dot(e, w(R_WQ, D, D), preferred_element_type=f32)
       + vrow(R_B_Q, D)) * SCALING                                   # (B, D)
  kv = (jnp.dot(kg_flat, w(R_WKV, D, 2 * D), preferred_element_type=f32)
        + vrow(R_B_KV, 2 * D))                                       # (B*S, 2D)
  k2 = kv[:, 0:D]                                                    # (B*S, D)
  v2 = kv[:, D:2 * D]                                                # (B*S, D)
  segT8 = w(R_SEGT8, BH, D)                                          # (BH, D)
  xmask = w(R_XMASK, BH, BS)                                         # (BH, BS)

  q8 = jnp.concatenate(
      [jnp.broadcast_to(q[i:i + 1, :], (H, D)) for i in range(B)],
      axis=0) * segT8                                                # (BH, D)
  s = jax.lax.dot_general(q8, k2, (((1,), (1,)), ((), ())),
                          preferred_element_type=f32) + xmask        # (BH, BS)
  m = jnp.max(s, axis=-1, keepdims=True)
  p_un = jnp.exp(s - m)
  denom = jnp.sum(p_un, axis=-1, keepdims=True)
  probs = p_un * pl.reciprocal(denom, approx=True)                   # EUP divide
  o8 = jnp.dot(probs, v2, preferred_element_type=f32) * segT8        # (BH, D)
  o_attn = jnp.concatenate(
      [jnp.sum(o8[i * H:(i + 1) * H, :], axis=0, keepdims=True) for i in range(B)],
      axis=0)                                                        # (B, D)
  ekg = (jnp.dot(o_attn, w(R_WOC, D, D), preferred_element_type=f32)
         + vrow(R_B_OC, D))
  e2 = layer_norm(e + ekg, 3)

  # --- FusionGate (no lane concat) -----------------------------------------------
  g1 = jax.nn.sigmoid(
      jnp.sum(e2 * vrow(R_G1K, D) + ekg * vrow(R_G1H, D),
              axis=-1, keepdims=True)
      + p_ref[R_SCAL:R_SCAL + 1, 1:2].astype(f32))
  e3 = g1 * e2 + (1.0 - g1) * ekg

  # --- FFN (activation after fc1 AND fc2, as in the reference) --------------------
  h1 = gelu(jnp.dot(e3, w(R_FC1, D, F), preferred_element_type=f32)
            + vrow(R_B_FC1, F))
  h2 = gelu(jnp.dot(h1, w(R_FC2, F, D), preferred_element_type=f32)
            + vrow(R_B_FC2, D))
  final = layer_norm(e3 + h2, 4)

  # --- single lane/sublane-dense (8,128) output tile: one unmasked full store ----
  row = jnp.concatenate(
      [t, final, jnp.zeros((B, LANES - 2 * D), f32)], axis=1)        # (B, 128)
  blk = jnp.concatenate(
      [row, jnp.zeros((8 - B, LANES), f32)], axis=0)                 # (8, 128)
  out_ref[...] = blk


# ----- wrapper-side packing -----------------------------------------------------
def pack_acts(cur_type, cur_entity, kg_gate_input, up_gate_input,
              hs_gru_input, kg_enc):
  """Lane-dense activation slab (ACT_ROWS, 128), f32."""
  kg_rows = jnp.pad(kg_enc.reshape(BS, D).astype(jnp.float32),
                    ((0, 0), (0, LANES - D)))
  vec_rows = jnp.concatenate(
      [cur_type, cur_entity, kg_gate_input, up_gate_input],
      axis=1).astype(jnp.float32)                                    # (B, 128)
  hs_rows = jnp.pad(hs_gru_input.astype(jnp.float32),
                    ((0, 0), (0, LANES - D)))
  return jnp.concatenate([kg_rows, vec_rows, hs_rows], axis=0)       # (20, 128)


def pack_params(p):
  """Build the bf16 parameter slab ONCE at init (hoisted out of per-call path)."""
  aw, ab = p['attn_w'], p['attn_b']
  wo_blk = jnp.zeros((2 * D, 2 * D), jnp.float32)
  wo_blk = wo_blk.at[0:D, 0:D].set(aw[3]).at[D:2 * D, D:2 * D].set(aw[7])
  segT = (jnp.arange(D)[None, :] // HD
          == jnp.arange(H)[:, None]).astype(jnp.float32)             # (H, D)
  segT8 = jnp.tile(segT, (B, 1))                                     # (BH, D)
  xmask = jnp.where(jnp.arange(BH)[:, None] // H
                    == jnp.arange(BS)[None, :] // S,
                    0.0, -1e9).astype(jnp.float32)                   # (BH, BS)

  slab = jnp.zeros((PSLAB_ROWS, 2 * D), jnp.float32)

  def put(s, r, arr):
    arr = jnp.asarray(arr, jnp.float32)
    if arr.ndim == 1:
      arr = arr[None, :]
    return s.at[r:r + arr.shape[0], 0:arr.shape[1]].set(arr)

  slab = put(slab, R_WKGHS, p['kg_hs_w'])
  slab = put(slab, R_WV, jnp.concatenate([aw[2], aw[6]], axis=1))
  slab = put(slab, R_WO, wo_blk)
  slab = put(slab, R_WQ, aw[8])
  slab = put(slab, R_WKV, jnp.concatenate([aw[9], aw[10]], axis=1))
  slab = put(slab, R_WOC, aw[11])
  slab = put(slab, R_FC1, p['fc1_w'])
  slab = put(slab, R_FC2, p['fc2_w'])
  slab = put(slab, R_SEGT8, segT8)
  slab = put(slab, R_XMASK, xmask)
  slab = put(slab, R_G0, p['gate_w'][:, 0])
  slab = put(slab, R_G1K, p['gate_w'][0:D, 1])
  slab = put(slab, R_G1H, p['gate_w'][D:2 * D, 1])
  slab = put(slab, R_B_KGHS, p['kg_hs_b'][0])
  slab = put(slab, R_B_V, jnp.concatenate([ab[2], ab[6]]))
  slab = put(slab, R_B_O, jnp.concatenate([ab[3], ab[7]]))
  slab = put(slab, R_B_Q, ab[8])
  slab = put(slab, R_B_KV, jnp.concatenate([ab[9], ab[10]]))
  slab = put(slab, R_B_OC, ab[11])
  slab = put(slab, R_B_FC1, p['fc1_b'][0])
  slab = put(slab, R_B_FC2, p['fc2_b'][0])
  slab = put(slab, R_LNG, p['ln_g'])
  slab = put(slab, R_LNB, p['ln_b'])
  slab = put(slab, R_SCAL, p['gate_b'][0])
  # bf16 storage: halves the HBM->VMEM param DMA; exact since params were
  # bf16-rounded at init.
  return slab.astype(jnp.bfloat16)


@jax.jit
def decoder_layer_step(pslab, cur_type, cur_entity, kg_gate_input,
                       up_gate_input, hs_gru_input, kg_enc):
  """Per-call path: activation pack + pallas_call only (param slab pre-built)."""
  acts = pack_acts(cur_type, cur_entity, kg_gate_input, up_gate_input,
                   hs_gru_input, kg_enc)                             # 1 input DMA
  out = pl.pallas_call(
      decoder_layer_kernel,
      out_shape=jax.ShapeDtypeStruct((8, LANES), jnp.float32),
      in_specs=[pl.BlockSpec(memory_space=pltpu.MemorySpace.VMEM),
                pl.BlockSpec(memory_space=pltpu.MemorySpace.VMEM),],
      out_specs=pl.BlockSpec(memory_space=pltpu.MemorySpace.VMEM),
  )(acts, pslab)
  return out[0:B, 0:D], out[0:B, D:2 * D]


# ----- pure-JAX reference (for correctness check) --------------------------------
def reference(inputs, p):
  def linear(x, w, b): return x @ w + b

  def ln(x, idx):
    g, b = p['ln_g'][idx], p['ln_b'][idx]
    mu = x.mean(-1, keepdims=True)
    var = ((x - mu) ** 2).mean(-1, keepdims=True)
    return (x - mu) / jnp.sqrt(var + EPS) * g + b

  def gelu(x):
    return 0.5 * x * (1 + jnp.tanh(math.sqrt(2 / math.pi)
                                   * (x + 0.044715 * x ** 3)))

  def mha(hidden, kv, base):
    wq, wk, wv, wo = [p['attn_w'][base + j] for j in range(4)]
    bq, bk, bv, bo = [p['attn_b'][base + j] for j in range(4)]
    Bh, T, _ = hidden.shape
    Sk = kv.shape[1]
    q = (linear(hidden, wq, bq) * SCALING).reshape(Bh, T, H, HD).transpose(0, 2, 1, 3)
    k = linear(kv, wk, bk).reshape(Bh, Sk, H, HD).transpose(0, 2, 1, 3)
    v = linear(kv, wv, bv).reshape(Bh, Sk, H, HD).transpose(0, 2, 1, 3)
    s = jnp.einsum('bhtd,bhsd->bhts', q, k)
    a = jax.nn.softmax(s, axis=-1)
    o = jnp.einsum('bhts,bhsd->bhtd', a, v).transpose(0, 2, 1, 3).reshape(Bh, T, D)
    return linear(o, wo, bo)

  ctype, cent = inputs['cur_type'], inputs['cur_entity']
  cur_emb = jnp.concatenate([ctype, cent], -1)
  g0 = jax.nn.sigmoid(cur_emb @ p['gate_w'][:, 0:1] + p['gate_b'][0, 0])
  kg_gate_out = g0 * inputs['kg_gate_input'] + (1 - g0) * inputs['up_gate_input']
  context = jnp.concatenate([inputs['hs_gru_input'], kg_gate_out], -1)
  context = jax.nn.sigmoid(linear(context, p['kg_hs_w'], p['kg_hs_b']))
  context = ln(context, 0)

  ctx3 = context[:, None, :]
  t = ln(ctype[:, None, :] + mha(ctype[:, None, :], ctx3, 0), 1)[:, 0, :]
  e = ln(cent[:, None, :] + mha(cent[:, None, :], ctx3, 4), 2)[:, 0, :]
  ekg = mha(e[:, None, :], inputs['kg_enc'], 8)[:, 0, :]
  e2 = ln(e + ekg, 3)
  fus_in = jnp.concatenate([e2, ekg], -1)
  g1 = jax.nn.sigmoid(fus_in @ p['gate_w'][:, 1:2] + p['gate_b'][0, 1])
  e3 = g1 * e2 + (1 - g1) * ekg
  h1 = gelu(linear(e3, p['fc1_w'], p['fc1_b']))
  h2 = gelu(linear(h1, p['fc2_w'], p['fc2_b']))
  final = ln(e3 + h2, 4)
  return t, final


if __name__ == "__main__":
  key = jax.random.PRNGKey(0)

  def nrm(k, shape, std=0.05):
    return (std * jax.random.normal(k, shape)).astype(jnp.float32)

  keys = iter(jax.random.split(key, 32))

  inputs = {
      'cur_type':      nrm(next(keys), (B, D), 1.0),
      'cur_entity':    nrm(next(keys), (B, D), 1.0),
      'kg_gate_input': nrm(next(keys), (B, D), 1.0),
      'up_gate_input': nrm(next(keys), (B, D), 1.0),
      'hs_gru_input':  nrm(next(keys), (B, D), 1.0),
      'kg_enc':        nrm(next(keys), (B, S, D), 1.0),
  }

  # weights stored pre-transposed to (in, out); attention order per block is
  # [q, k, v, out] for type_context_attn (0-3), entity_context_attn (4-7),
  # type_hs_attn (8-11).  LayerNorm rows: [kg_hs, type_ctx, entity_ctx,
  # entity_kg, final].
  params = {
      'attn_w':  nrm(next(keys), (12, D, D)),
      'attn_b':  nrm(next(keys), (12, D), 0.01),
      'kg_hs_w': nrm(next(keys), (2 * D, D)),
      'kg_hs_b': nrm(next(keys), (1, D), 0.01),
      'gate_w':  nrm(next(keys), (2 * D, 2)),        # col0: kg_gate, col1: fusion
      'gate_b':  nrm(next(keys), (1, 2), 0.01),
      'ln_g':    (1.0 + nrm(next(keys), (5, D), 0.1)).astype(jnp.float32),
      'ln_b':    nrm(next(keys), (5, D), 0.1),
      'fc1_w':   nrm(next(keys), (D, F)),
      'fc1_b':   nrm(next(keys), (1, F), 0.01),
      'fc2_w':   nrm(next(keys), (F, D)),
      'fc2_b':   nrm(next(keys), (1, D), 0.01),
  }
  # Round params to bf16-representable values so the bf16 slab is an exact
  # copy; the reference uses the same rounded params (fair comparison).
  params = jax.tree_util.tree_map(
      lambda a: a.astype(jnp.bfloat16).astype(jnp.float32), params)

  pslab = pack_params(params)        # built ONCE, stays resident on device

  out_t, out_e = jax.block_until_ready(
      decoder_layer_step(pslab,
                         inputs['cur_type'], inputs['cur_entity'],
                         inputs['kg_gate_input'], inputs['up_gate_input'],
                         inputs['hs_gru_input'], inputs['kg_enc']))
  ref_t, ref_e = reference(inputs, params)

  assert out_t.shape == (B, D) and out_e.shape == (B, D)
  # tolerance covers approx-reciprocal softmax + E[x^2]-mu^2 LN variance.
  np.testing.assert_allclose(np.asarray(out_t), np.asarray(ref_t),
                             rtol=2e-3, atol=2e-3)
  np.testing.assert_allclose(np.asarray(out_e), np.asarray(ref_e),
                             rtol=2e-3, atol=2e-3)
  print("KERNEL_OK")
</pallas_src>

<mosaic_0001>
module attributes {stable_mosaic.version = 11 : i64} {
  func.func @decoder_layer_kernel(%arg0: memref<20x128xf32, #tpu.memory_space<vmem>>, %arg1: memref<392x64xbf16, #tpu.memory_space<vmem>>, %arg2: memref<8x128xf32, #tpu.memory_space<vmem>>) attributes {dimension_semantics = [], scalar_prefetch = 0 : i64, scratch_operands = 0 : i64, tpu.core_type = #tpu.core_type<tc>} {
    %c0 = arith.constant 0 : index
    %c0_0 = arith.constant 0 : index
    %0 = vector.load %arg0[%c0, %c0_0] : memref<20x128xf32, #tpu.memory_space<vmem>>, vector<16x32xf32>
    %c16 = arith.constant 16 : index
    %c0_1 = arith.constant 0 : index
    %1 = vector.load %arg0[%c16, %c0_1] : memref<20x128xf32, #tpu.memory_space<vmem>>, vector<2x128xf32>
    %2 = vector.extract_strided_slice %1 {offsets = [0, 0], sizes = [2, 32], strides = [1, 1]} : vector<2x128xf32> to vector<2x32xf32>
    %3 = vector.extract_strided_slice %1 {offsets = [0, 32], sizes = [2, 32], strides = [1, 1]} : vector<2x128xf32> to vector<2x32xf32>
    %4 = vector.extract_strided_slice %1 {offsets = [0, 64], sizes = [2, 32], strides = [1, 1]} : vector<2x128xf32> to vector<2x32xf32>
    %5 = vector.extract_strided_slice %1 {offsets = [0, 96], sizes = [2, 32], strides = [1, 1]} : vector<2x128xf32> to vector<2x32xf32>
    %c18 = arith.constant 18 : index
    %c0_2 = arith.constant 0 : index
    %6 = vector.load %arg0[%c18, %c0_2] : memref<20x128xf32, #tpu.memory_space<vmem>>, vector<2x32xf32>
    %7 = vector.extract_strided_slice %1 {offsets = [0, 0], sizes = [2, 64], strides = [1, 1]} : vector<2x128xf32> to vector<2x64xf32>
    %c368 = arith.constant 368 : index
    %c0_3 = arith.constant 0 : index
    %8 = vector.load %arg1[%c368, %c0_3] : memref<392x64xbf16, #tpu.memory_space<vmem>>, vector<1x64xbf16>
    %9 = arith.extf %8 : vector<1x64xbf16> to vector<1x64xf32>
    %10 = vector.broadcast %9 : vector<1x64xf32> to vector<2x64xf32>
    %11 = arith.mulf %7, %10 : vector<2x64xf32>
    %cst = arith.constant dense<0.000000e+00> : vector<2xf32>
    %12 = vector.multi_reduction <add>, %11, %cst [1] : vector<2x64xf32> to vector<2xf32>
    %13 = vector.shape_cast %12 : vector<2xf32> to vector<2x1xf32>
    %c389 = arith.constant 389 : index
    %c0_4 = arith.constant 0 : index
    %14 = vector.load %arg1[%c389, %c0_4] : memref<392x64xbf16, #tpu.memory_space<vmem>>, vector<1x1xbf16>
    %15 = arith.extf %14 : vector<1x1xbf16> to vector<1x1xf32>
    %16 = vector.broadcast %15 : vector<1x1xf32> to vector<2x1xf32>
    %17 = arith.addf %13, %16 : vector<2x1xf32>
    %18 = arith.negf %17 : vector<2x1xf32>
    %19 = math.exp %18 : vector<2x1xf32>
    %cst_5 = arith.constant 1.000000e+00 : f32
    %20 = vector.broadcast %cst_5 : f32 to vector<2x1xf32>
    %21 = arith.addf %20, %19 : vector<2x1xf32>
    %22 = arith.divf %20, %21 : vector<2x1xf32>
    %23 = vector.broadcast %22 : vector<2x1xf32> to vector<2x32xf32>
    %24 = arith.mulf %23, %4 : vector<2x32xf32>
    %cst_6 = arith.constant 1.000000e+00 : f32
    %25 = vector.broadcast %cst_6 : f32 to vector<2x1xf32>
    %26 = arith.subf %25, %22 : vector<2x1xf32>
    %27 = vector.broadcast %26 : vector<2x1xf32> to vector<2x32xf32>
    %28 = arith.mulf %27, %5 : vector<2x32xf32>
    %29 = arith.addf %24, %28 : vector<2x32xf32>
    %30 = tpu.concatenate %6, %29 in 1 : vector<2x32xf32>, vector<2x32xf32> -> vector<2x64xf32>
    %c0_7 = arith.constant 0 : index
    %c0_8 = arith.constant 0 : index
    %31 = vector.load %arg1[%c0_7, %c0_8] : memref<392x64xbf16, #tpu.memory_space<vmem>>, vector<64x32xbf16>
    %32 = arith.extf %31 : vector<64x32xbf16> to vector<64x32xf32>
    %cst_9 = arith.constant dense<0.000000e+00> : vector<2x32xf32>
    %33 = tpu.matmul %30, %32, %cst_9 {dimension_numbers = #tpu.dot_dimension_numbers<[1], [0], [0], [1], [0, 0, 1, 1], [], []>} : vector<2x64xf32>, vector<64x32xf32>, vector<2x32xf32> -> vector<2x32xf32>
    %c371 = arith.constant 371 : index
    %c0_10 = arith.constant 0 : index
    %34 = vector.load %arg1[%c371, %c0_10] : memref<392x64xbf16, #tpu.memory_space<vmem>>, vector<1x32xbf16>
    %35 = arith.extf %34 : vector<1x32xbf16> to vector<1x32xf32>
    %36 = vector.broadcast %35 : vector<1x32xf32> to vector<2x32xf32>
    %37 = arith.addf %33, %36 : vector<2x32xf32>
    %38 = arith.negf %37 : vector<2x32xf32>
    %39 = math.exp %38 : vector<2x32xf32>
    %cst_11 = arith.constant 1.000000e+00 : f32
    %40 = vector.broadcast %cst_11 : f32 to vector<2x32xf32>
    %41 = arith.addf %40, %39 : vector<2x32xf32>
    %42 = arith.divf %40, %41 : vector<2x32xf32>
    %c379 = arith.constant 379 : index
    %c0_12 = arith.constant 0 : index
    %43 = vector.load %arg1[%c379, %c0_12] : memref<392x64xbf16, #tpu.memory_space<vmem>>, vector<1x32xbf16>
    %44 = arith.extf %43 : vector<1x32xbf16> to vector<1x32xf32>
    %c384 = arith.constant 384 : index
    %c0_13 = arith.constant 0 : index
    %45 = vector.load %arg1[%c384, %c0_13] : memref<392x64xbf16, #tpu.memory_space<vmem>>, vector<1x32xbf16>
    %46 = arith.extf %45 : vector<1x32xbf16> to vector<1x32xf32>
    %cst_14 = arith.constant dense<0.000000e+00> : vector<2xf32>
    %47 = vector.multi_reduction <add>, %42, %cst_14 [1] : vector<2x32xf32> to vector<2xf32>
    %48 = vector.shape_cast %47 : vector<2xf32> to vector<2x1xf32>
    %cst_15 = arith.constant 3.200000e+01 : f32
    %49 = vector.broadcast %cst_15 : f32 to vector<2x1xf32>
    %50 = arith.divf %48, %49 : vector<2x1xf32>
    %51 = arith.mulf %42, %42 : vector<2x32xf32>
    %cst_16 = arith.constant dense<0.000000e+00> : vector<2xf32>
    %52 = vector.multi_reduction <add>, %51, %cst_16 [1] : vector<2x32xf32> to vector<2xf32>
    %53 = vector.shape_cast %52 : vector<2xf32> to vector<2x1xf32>
    %cst_17 = arith.constant 3.200000e+01 : f32
    %54 = vector.broadcast %cst_17 : f32 to vector<2x1xf32>
    %55 = arith.divf %53, %54 : vector<2x1xf32>
    %56 = arith.mulf %50, %50 : vector<2x1xf32>
    %57 = arith.subf %55, %56 : vector<2x1xf32>
    %58 = vector.broadcast %50 : vector<2x1xf32> to vector<2x32xf32>
    %59 = arith.subf %42, %58 : vector<2x32xf32>
    %cst_18 = arith.constant 9.99999974E-6 : f32
    %60 = vector.broadcast %cst_18 : f32 to vector<2x1xf32>
    %61 = arith.addf %57, %60 : vector<2x1xf32>
    %62 = math.rsqrt %61 : vector<2x1xf32>
    %63 = vector.broadcast %62 : vector<2x1xf32> to vector<2x32xf32>
    %64 = arith.mulf %59, %63 : vector<2x32xf32>
    %65 = vector.broadcast %44 : vector<1x32xf32> to vector<2x32xf32>
    %66 = arith.mulf %64, %65 : vector<2x32xf32>
    %67 = vector.broadcast %46 : vector<1x32xf32> to vector<2x32xf32>
    %68 = arith.addf %66, %67 : vector<2x32xf32>
    %c64 = arith.constant 64 : index
    %c0_19 = arith.constant 0 : index
    %69 = vector.load %arg1[%c64, %c0_19] : memref<392x64xbf16, #tpu.memory_space<vmem>>, vector<32x64xbf16>
    %70 = arith.extf %69 : vector<32x64xbf16> to vector<32x64xf32>
    %cst_20 = arith.constant dense<0.000000e+00> : vector<2x64xf32>
    %71 = tpu.matmul %68, %70, %cst_20 {dimension_numbers = #tpu.dot_dimension_numbers<[1], [0], [0], [1], [0, 0, 1, 1], [], []>} : vector<2x32xf32>, vector<32x64xf32>, vector<2x64xf32> -> vector<2x64xf32>
    %c372 = arith.constant 372 : index
    %c0_21 = arith.constant 0 : index
    %72 = vector.load %arg1[%c372, %c0_21] : memref<392x64xbf16, #tpu.memory_space<vmem>>, vector<1x64xbf16>
    %73 = arith.extf %72 : vector<1x64xbf16> to vector<1x64xf32>
    %74 = vector.broadcast %73 : vector<1x64xf32> to vector<2x64xf32>
    %75 = arith.addf %71, %74 : vector<2x64xf32>
    %c96 = arith.constant 96 : index
    %c0_22 = arith.constant 0 : index
    %76 = vector.load %arg1[%c96, %c0_22] : memref<392x64xbf16, #tpu.memory_space<vmem>>, vector<64x64xbf16>
    %77 = arith.extf %76 : vector<64x64xbf16> to vector<64x64xf32>
    %cst_23 = arith.constant dense<0.000000e+00> : vector<2x64xf32>
    %78 = tpu.matmul %75, %77, %cst_23 {dimension_numbers = #tpu.dot_dimension_numbers<[1], [0], [0], [1], [0, 0, 1, 1], [], []>} : vector<2x64xf32>, vector<64x64xf32>, vector<2x64xf32> -> vector<2x64xf32>
    %c373 = arith.constant 373 : index
    %c0_24 = arith.constant 0 : index
    %79 = vector.load %arg1[%c373, %c0_24] : memref<392x64xbf16, #tpu.memory_space<vmem>>, vector<1x64xbf16>
    %80 = arith.extf %79 : vector<1x64xbf16> to vector<1x64xf32>
    %81 = vector.broadcast %80 : vector<1x64xf32> to vector<2x64xf32>
    %82 = arith.addf %78, %81 : vector<2x64xf32>
    %83 = vector.extract_strided_slice %82 {offsets = [0, 0], sizes = [2, 32], strides = [1, 1]} : vector<2x64xf32> to vector<2x32xf32>
    %84 = arith.addf %2, %83 : vector<2x32xf32>
    %c380 = arith.constant 380 : index
    %c0_25 = arith.constant 0 : index
    %85 = vector.load %arg1[%c380, %c0_25] : memref<392x64xbf16, #tpu.memory_space<vmem>>, vector<1x32xbf16>
    %86 = arith.extf %85 : vector<1x32xbf16> to vector<1x32xf32>
    %c385 = arith.constant 385 : index
    %c0_26 = arith.constant 0 : index
    %87 = vector.load %arg1[%c385, %c0_26] : memref<392x64xbf16, #tpu.memory_space<vmem>>, vector<1x32xbf16>
    %88 = arith.extf %87 : vector<1x32xbf16> to vector<1x32xf32>
    %cst_27 = arith.constant dense<0.000000e+00> : vector<2xf32>
    %89 = vector.multi_reduction <add>, %84, %cst_27 [1] : vector<2x32xf32> to vector<2xf32>
    %90 = vector.shape_cast %89 : vector<2xf32> to vector<2x1xf32>
    %cst_28 = arith.constant 3.200000e+01 : f32
    %91 = vector.broadcast %cst_28 : f32 to vector<2x1xf32>
    %92 = arith.divf %90, %91 : vector<2x1xf32>
    %93 = arith.mulf %84, %84 : vector<2x32xf32>
    %cst_29 = arith.constant dense<0.000000e+00> : vector<2xf32>
    %94 = vector.multi_reduction <add>, %93, %cst_29 [1] : vector<2x32xf32> to vector<2xf32>
    %95 = vector.shape_cast %94 : vector<2xf32> to vector<2x1xf32>
    %cst_30 = arith.constant 3.200000e+01 : f32
    %96 = vector.broadcast %cst_30 : f32 to vector<2x1xf32>
    %97 = arith.divf %95, %96 : vector<2x1xf32>
    %98 = arith.mulf %92, %92 : vector<2x1xf32>
    %99 = arith.subf %97, %98 : vector<2x1xf32>
    %100 = vector.broadcast %92 : vector<2x1xf32> to vector<2x32xf32>
    %101 = arith.subf %84, %100 : vector<2x32xf32>
    %cst_31 = arith.constant 9.99999974E-6 : f32
    %102 = vector.broadcast %cst_31 : f32 to vector<2x1xf32>
    %103 = arith.addf %99, %102 : vector<2x1xf32>
    %104 = math.rsqrt %103 : vector<2x1xf32>
    %105 = vector.broadcast %104 : vector<2x1xf32> to vector<2x32xf32>
    %106 = arith.mulf %101, %105 : vector<2x32xf32>
    %107 = vector.broadcast %86 : vector<1x32xf32> to vector<2x32xf32>
    %108 = arith.mulf %106, %107 : vector<2x32xf32>
    %109 = vector.broadcast %88 : vector<1x32xf32> to vector<2x32xf32>
    %110 = arith.addf %108, %109 : vector<2x32xf32>
    %111 = vector.extract_strided_slice %82 {offsets = [0, 32], sizes = [2, 32], strides = [1, 1]} : vector<2x64xf32> to vector<2x32xf32>
    %112 = arith.addf %3, %111 : vector<2x32xf32>
    %c381 = arith.constant 381 : index
    %c0_32 = arith.constant 0 : index
    %113 = vector.load %arg1[%c381, %c0_32] : memref<392x64xbf16, #tpu.memory_space<vmem>>, vector<1x32xbf16>
    %114 = arith.extf %113 : vector<1x32xbf16> to vector<1x32xf32>
    %c386 = arith.constant 386 : index
    %c0_33 = arith.constant 0 : index
    %115 = vector.load %arg1[%c386, %c0_33] : memref<392x64xbf16, #tpu.memory_space<vmem>>, vector<1x32xbf16>
    %116 = arith.extf %115 : vector<1x32xbf16> to vector<1x32xf32>
    %cst_34 = arith.constant dense<0.000000e+00> : vector<2xf32>
    %117 = vector.multi_reduction <add>, %112, %cst_34 [1] : vector<2x32xf32> to vector<2xf32>
    %118 = vector.shape_cast %117 : vector<2xf32> to vector<2x1xf32>
    %cst_35 = arith.constant 3.200000e+01 : f32
    %119 = vector.broadcast %cst_35 : f32 to vector<2x1xf32>
    %120 = arith.divf %118, %119 : vector<2x1xf32>
    %121 = arith.mulf %112, %112 : vector<2x32xf32>
    %cst_36 = arith.constant dense<0.000000e+00> : vector<2xf32>
    %122 = vector.multi_reduction <add>, %121, %cst_36 [1] : vector<2x32xf32> to vector<2xf32>
    %123 = vector.shape_cast %122 : vector<2xf32> to vector<2x1xf32>
    %cst_37 = arith.constant 3.200000e+01 : f32
    %124 = vector.broadcast %cst_37 : f32 to vector<2x1xf32>
    %125 = arith.divf %123, %124 : vector<2x1xf32>
    %126 = arith.mulf %120, %120 : vector<2x1xf32>
    %127 = arith.subf %125, %126 : vector<2x1xf32>
    %128 = vector.broadcast %120 : vector<2x1xf32> to vector<2x32xf32>
    %129 = arith.subf %112, %128 : vector<2x32xf32>
    %cst_38 = arith.constant 9.99999974E-6 : f32
    %130 = vector.broadcast %cst_38 : f32 to vector<2x1xf32>
    %131 = arith.addf %127, %130 : vector<2x1xf32>
    %132 = math.rsqrt %131 : vector<2x1xf32>
    %133 = vector.broadcast %132 : vector<2x1xf32> to vector<2x32xf32>
    %134 = arith.mulf %129, %133 : vector<2x32xf32>
    %135 = vector.broadcast %114 : vector<1x32xf32> to vector<2x32xf32>
    %136 = arith.mulf %134, %135 : vector<2x32xf32>
    %137 = vector.broadcast %116 : vector<1x32xf32> to vector<2x32xf32>
    %138 = arith.addf %136, %137 : vector<2x32xf32>
    %c160 = arith.constant 160 : index
    %c0_39 = arith.constant 0 : index
    %139 = vector.load %arg1[%c160, %c0_39] : memref<392x64xbf16, #tpu.memory_space<vmem>>, vector<32x32xbf16>
    %140 = arith.extf %139 : vector<32x32xbf16> to vector<32x32xf32>
    %cst_40 = arith.constant dense<0.000000e+00> : vector<2x32xf32>
    %141 = tpu.matmul %138, %140, %cst_40 {dimension_numbers = #tpu.dot_dimension_numbers<[1], [0], [0], [1], [0, 0, 1, 1], [], []>} : vector<2x32xf32>, vector<32x32xf32>, vector<2x32xf32> -> vector<2x32xf32>
    %c374 = arith.constant 374 : index
    %c0_41 = arith.constant 0 : index
    %142 = vector.load %arg1[%c374, %c0_41] : memref<392x64xbf16, #tpu.memory_space<vmem>>, vector<1x32xbf16>
    %143 = arith.extf %142 : vector<1x32xbf16> to vector<1x32xf32>
    %144 = vector.broadcast %143 : vector<1x32xf32> to vector<2x32xf32>
    %145 = arith.addf %141, %144 : vector<2x32xf32>
    %cst_42 = arith.constant 0.353553385 : f32
    %146 = vector.broadcast %cst_42 : f32 to vector<2x32xf32>
    %147 = arith.mulf %145, %146 : vector<2x32xf32>
    %c192 = arith.constant 192 : index
    %c0_43 = arith.constant 0 : index
    %148 = vector.load %arg1[%c192, %c0_43] : memref<392x64xbf16, #tpu.memory_space<vmem>>, vector<32x64xbf16>
    %149 = arith.extf %148 : vector<32x64xbf16> to vector<32x64xf32>
    %cst_44 = arith.constant dense<0.000000e+00> : vector<16x64xf32>
    %150 = tpu.matmul %0, %149, %cst_44 {dimension_numbers = #tpu.dot_dimension_numbers<[1], [0], [0], [1], [0, 0, 1, 1], [], []>} : vector<16x32xf32>, vector<32x64xf32>, vector<16x64xf32> -> vector<16x64xf32>
    %c375 = arith.constant 375 : index
    %c0_45 = arith.constant 0 : index
    %151 = vector.load %arg1[%c375, %c0_45] : memref<392x64xbf16, #tpu.memory_space<vmem>>, vector<1x64xbf16>
    %152 = arith.extf %151 : vector<1x64xbf16> to vector<1x64xf32>
    %153 = vector.broadcast %152 : vector<1x64xf32> to vector<16x64xf32>
    %154 = arith.addf %150, %153 : vector<16x64xf32>
    %155 = vector.extract_strided_slice %154 {offsets = [0, 0], sizes = [16, 32], strides = [1, 1]} : vector<16x64xf32> to vector<16x32xf32>
    %156 = vector.extract_strided_slice %154 {offsets = [0, 32], sizes = [16, 32], strides = [1, 1]} : vector<16x64xf32> to vector<16x32xf32>
    %c352 = arith.constant 352 : index
    %c0_46 = arith.constant 0 : index
    %157 = vector.load %arg1[%c352, %c0_46] : memref<392x64xbf16, #tpu.memory_space<vmem>>, vector<8x32xbf16>
    %158 = arith.extf %157 : vector<8x32xbf16> to vector<8x32xf32>
    %c360 = arith.constant 360 : index
    %c0_47 = arith.constant 0 : index
    %159 = vector.load %arg1[%c360, %c0_47] : memref<392x64xbf16, #tpu.memory_space<vmem>>, vector<8x16xbf16>
    %160 = arith.extf %159 : vector<8x16xbf16> to vector<8x16xf32>
    %161 = vector.extract_strided_slice %147 {offsets = [0, 0], sizes = [1, 32], strides = [1, 1]} : vector<2x32xf32> to vector<1x32xf32>
    %162 = vector.shape_cast %161 : vector<1x32xf32> to vector<1x32xf32>
    %163 = vector.broadcast %162 : vector<1x32xf32> to vector<4x32xf32>
    %164 = vector.extract_strided_slice %147 {offsets = [1, 0], sizes = [1, 32], strides = [1, 1]} : vector<2x32xf32> to vector<1x32xf32>
    %165 = vector.shape_cast %164 : vector<1x32xf32> to vector<1x32xf32>
    %166 = vector.broadcast %165 : vector<1x32xf32> to vector<4x32xf32>
    %167 = tpu.concatenate %163, %166 in 0 : vector<4x32xf32>, vector<4x32xf32> -> vector<8x32xf32>
    %168 = arith.mulf %167, %158 : vector<8x32xf32>
    %cst_48 = arith.constant dense<0.000000e+00> : vector<8x16xf32>
    %169 = tpu.matmul %168, %155, %cst_48 {dimension_numbers = #tpu.dot_dimension_numbers<[1], [1], [0], [0], [0, 0, 1, 0], [], []>} : vector<8x32xf32>, vector<16x32xf32>, vector<8x16xf32> -> vector<8x16xf32>
    %170 = arith.addf %169, %160 : vector<8x16xf32>
    %cst_49 = arith.constant dense<0xFF800000> : vector<8xf32>
    %171 = vector.multi_reduction <maximumf>, %170, %cst_49 [1] : vector<8x16xf32> to vector<8xf32>
    %172 = vector.shape_cast %171 : vector<8xf32> to vector<8x1xf32>
    %173 = vector.broadcast %172 : vector<8x1xf32> to vector<8x16xf32>
    %174 = arith.subf %170, %173 : vector<8x16xf32>
    %175 = math.exp %174 : vector<8x16xf32>
    %cst_50 = arith.constant dense<0.000000e+00> : vector<8xf32>
    %176 = vector.multi_reduction <add>, %175, %cst_50 [1] : vector<8x16xf32> to vector<8xf32>
    %177 = vector.shape_cast %176 : vector<8xf32> to vector<8x1xf32>
    %178 = tpu.reciprocal %177 {approx = true} : vector<8x1xf32> -> vector<8x1xf32>
    %179 = vector.broadcast %178 : vector<8x1xf32> to vector<8x16xf32>
    %180 = arith.mulf %175, %179 : vector<8x16xf32>
    %cst_51 = arith.constant dense<0.000000e+00> : vector<8x32xf32>
    %181 = tpu.matmul %180, %156, %cst_51 {dimension_numbers = #tpu.dot_dimension_numbers<[1], [0], [0], [1], [0, 0, 1, 1], [], []>} : vector<8x16xf32>, vector<16x32xf32>, vector<8x32xf32> -> vector<8x32xf32>
    %182 = arith.mulf %181, %158 : vector<8x32xf32>
    %183 = vector.extract_strided_slice %182 {offsets = [0, 0], sizes = [4, 32], strides = [1, 1]} : vector<8x32xf32> to vector<4x32xf32>
    %cst_52 = arith.constant dense<0.000000e+00> : vector<32xf32>
    %184 = vector.multi_reduction <add>, %183, %cst_52 [0] : vector<4x32xf32> to vector<32xf32>
    %185 = vector.shape_cast %184 : vector<32xf32> to vector<1x32xf32>
    %186 = vector.extract_strided_slice %182 {offsets = [4, 0], sizes = [4, 32], strides = [1, 1]} : vector<8x32xf32> to vector<4x32xf32>
    %cst_53 = arith.constant dense<0.000000e+00> : vector<32xf32>
    %187 = vector.multi_reduction <add>, %186, %cst_53 [0] : vector<4x32xf32> to vector<32xf32>
    %188 = vector.shape_cast %187 : vector<32xf32> to vector<1x32xf32>
    %189 = tpu.concatenate %185, %188 in 0 : vector<1x32xf32>, vector<1x32xf32> -> vector<2x32xf32>
    %c224 = arith.constant 224 : index
    %c0_54 = arith.constant 0 : index
    %190 = vector.load %arg1[%c224, %c0_54] : memref<392x64xbf16, #tpu.memory_space<vmem>>, vector<32x32xbf16>
    %191 = arith.extf %190 : vector<32x32xbf16> to vector<32x32xf32>
    %cst_55 = arith.constant dense<0.000000e+00> : vector<2x32xf32>
    %192 = tpu.matmul %189, %191, %cst_55 {dimension_numbers = #tpu.dot_dimension_numbers<[1], [0], [0], [1], [0, 0, 1, 1], [], []>} : vector<2x32xf32>, vector<32x32xf32>, vector<2x32xf32> -> vector<2x32xf32>
    %c376 = arith.constant 376 : index
    %c0_56 = arith.constant 0 : index
    %193 = vector.load %arg1[%c376, %c0_56] : memref<392x64xbf16, #tpu.memory_space<vmem>>, vector<1x32xbf16>
    %194 = arith.extf %193 : vector<1x32xbf16> to vector<1x32xf32>
    %195 = vector.broadcast %194 : vector<1x32xf32> to vector<2x32xf32>
    %196 = arith.addf %192, %195 : vector<2x32xf32>
    %197 = arith.addf %138, %196 : vector<2x32xf32>
    %c382 = arith.constant 382 : index
    %c0_57 = arith.constant 0 : index
    %198 = vector.load %arg1[%c382, %c0_57] : memref<392x64xbf16, #tpu.memory_space<vmem>>, vector<1x32xbf16>
    %199 = arith.extf %198 : vector<1x32xbf16> to vector<1x32xf32>
    %c387 = arith.constant 387 : index
    %c0_58 = arith.constant 0 : index
    %200 = vector.load %arg1[%c387, %c0_58] : memref<392x64xbf16, #tpu.memory_space<vmem>>, vector<1x32xbf16>
    %201 = arith.extf %200 : vector<1x32xbf16> to vector<1x32xf32>
    %cst_59 = arith.constant dense<0.000000e+00> : vector<2xf32>
    %202 = vector.multi_reduction <add>, %197, %cst_59 [1] : vector<2x32xf32> to vector<2xf32>
    %203 = vector.shape_cast %202 : vector<2xf32> to vector<2x1xf32>
    %cst_60 = arith.constant 3.200000e+01 : f32
    %204 = vector.broadcast %cst_60 : f32 to vector<2x1xf32>
    %205 = arith.divf %203, %204 : vector<2x1xf32>
    %206 = arith.mulf %197, %197 : vector<2x32xf32>
    %cst_61 = arith.constant dense<0.000000e+00> : vector<2xf32>
    %207 = vector.multi_reduction <add>, %206, %cst_61 [1] : vector<2x32xf32> to vector<2xf32>
    %208 = vector.shape_cast %207 : vector<2xf32> to vector<2x1xf32>
    %cst_62 = arith.constant 3.200000e+01 : f32
    %209 = vector.broadcast %cst_62 : f32 to vector<2x1xf32>
    %210 = arith.divf %208, %209 : vector<2x1xf32>
    %211 = arith.mulf %205, %205 : vector<2x1xf32>
    %212 = arith.subf %210, %211 : vector<2x1xf32>
    %213 = vector.broadcast %205 : vector<2x1xf32> to vector<2x32xf32>
    %214 = arith.subf %197, %213 : vector<2x32xf32>
    %cst_63 = arith.constant 9.99999974E-6 : f32
    %215 = vector.broadcast %cst_63 : f32 to vector<2x1xf32>
    %216 = arith.addf %212, %215 : vector<2x1xf32>
    %217 = math.rsqrt %216 : vector<2x1xf32>
    %218 = vector.broadcast %217 : vector<2x1xf32> to vector<2x32xf32>
    %219 = arith.mulf %214, %218 : vector<2x32xf32>
    %220 = vector.broadcast %199 : vector<1x32xf32> to vector<2x32xf32>
    %221 = arith.mulf %219, %220 : vector<2x32xf32>
    %222 = vector.broadcast %201 : vector<1x32xf32> to vector<2x32xf32>
    %223 = arith.addf %221, %222 : vector<2x32xf32>
    %c369 = arith.constant 369 : index
    %c0_64 = arith.constant 0 : index
    %224 = vector.load %arg1[%c369, %c0_64] : memref<392x64xbf16, #tpu.memory_space<vmem>>, vector<1x32xbf16>
    %225 = arith.extf %224 : vector<1x32xbf16> to vector<1x32xf32>
    %226 = vector.broadcast %225 : vector<1x32xf32> to vector<2x32xf32>
    %227 = arith.mulf %223, %226 : vector<2x32xf32>
    %c370 = arith.constant 370 : index
    %c0_65 = arith.constant 0 : index
    %228 = vector.load %arg1[%c370, %c0_65] : memref<392x64xbf16, #tpu.memory_space<vmem>>, vector<1x32xbf16>
    %229 = arith.extf %228 : vector<1x32xbf16> to vector<1x32xf32>
    %230 = vector.broadcast %229 : vector<1x32xf32> to vector<2x32xf32>
    %231 = arith.mulf %196, %230 : vector<2x32xf32>
    %232 = arith.addf %227, %231 : vector<2x32xf32>
    %cst_66 = arith.constant dense<0.000000e+00> : vector<2xf32>
    %233 = vector.multi_reduction <add>, %232, %cst_66 [1] : vector<2x32xf32> to vector<2xf32>
    %234 = vector.shape_cast %233 : vector<2xf32> to vector<2x1xf32>
    %c389_67 = arith.constant 389 : index
    %c1 = arith.constant 1 : index
    %235 = vector.load %arg1[%c389_67, %c1] : memref<392x64xbf16, #tpu.memory_space<vmem>>, vector<1x1xbf16>
    %236 = arith.extf %235 : vector<1x1xbf16> to vector<1x1xf32>
    %237 = vector.broadcast %236 : vector<1x1xf32> to vector<2x1xf32>
    %238 = arith.addf %234, %237 : vector<2x1xf32>
    %239 = arith.negf %238 : vector<2x1xf32>
    %240 = math.exp %239 : vector<2x1xf32>
    %cst_68 = arith.constant 1.000000e+00 : f32
    %241 = vector.broadcast %cst_68 : f32 to vector<2x1xf32>
    %242 = arith.addf %241, %240 : vector<2x1xf32>
    %243 = arith.divf %241, %242 : vector<2x1xf32>
    %244 = vector.broadcast %243 : vector<2x1xf32> to vector<2x32xf32>
    %245 = arith.mulf %244, %223 : vector<2x32xf32>
    %cst_69 = arith.constant 1.000000e+00 : f32
    %246 = vector.broadcast %cst_69 : f32 to vector<2x1xf32>
    %247 = arith.subf %246, %243 : vector<2x1xf32>
    %248 = vector.broadcast %247 : vector<2x1xf32> to vector<2x32xf32>
    %249 = arith.mulf %248, %196 : vector<2x32xf32>
    %250 = arith.addf %245, %249 : vector<2x32xf32>
    %c256 = arith.constant 256 : index
    %c0_70 = arith.constant 0 : index
    %251 = vector.load %arg1[%c256, %c0_70] : memref<392x64xbf16, #tpu.memory_space<vmem>>, vector<32x64xbf16>
    %252 = arith.extf %251 : vector<32x64xbf16> to vector<32x64xf32>
    %cst_71 = arith.constant dense<0.000000e+00> : vector<2x64xf32>
    %253 = tpu.matmul %250, %252, %cst_71 {dimension_numbers = #tpu.dot_dimension_numbers<[1], [0], [0], [1], [0, 0, 1, 1], [], []>} : vector<2x32xf32>, vector<32x64xf32>, vector<2x64xf32> -> vector<2x64xf32>
    %c377 = arith.constant 377 : index
    %c0_72 = arith.constant 0 : index
    %254 = vector.load %arg1[%c377, %c0_72] : memref<392x64xbf16, #tpu.memory_space<vmem>>, vector<1x64xbf16>
    %255 = arith.extf %254 : vector<1x64xbf16> to vector<1x64xf32>
    %256 = vector.broadcast %255 : vector<1x64xf32> to vector<2x64xf32>
    %257 = arith.addf %253, %256 : vector<2x64xf32>
    %cst_73 = arith.constant 5.000000e-01 : f32
    %258 = vector.broadcast %cst_73 : f32 to vector<2x64xf32>
    %259 = arith.mulf %258, %257 : vector<2x64xf32>
    %cst_74 = arith.constant 4.471500e-02 : f32
    %260 = vector.broadcast %cst_74 : f32 to vector<2x64xf32>
    %261 = arith.mulf %260, %257 : vector<2x64xf32>
    %262 = arith.mulf %261, %257 : vector<2x64xf32>
    %263 = arith.mulf %262, %257 : vector<2x64xf32>
    %264 = arith.addf %257, %263 : vector<2x64xf32>
    %cst_75 = arith.constant 0.797884583 : f32
    %265 = vector.broadcast %cst_75 : f32 to vector<2x64xf32>
    %266 = arith.mulf %265, %264 : vector<2x64xf32>
    %267 = math.tanh %266 : vector<2x64xf32>
    %cst_76 = arith.constant 1.000000e+00 : f32
    %268 = vector.broadcast %cst_76 : f32 to vector<2x64xf32>
    %269 = arith.addf %268, %267 : vector<2x64xf32>
    %270 = arith.mulf %259, %269 : vector<2x64xf32>
    %c288 = arith.constant 288 : index
    %c0_77 = arith.constant 0 : index
    %271 = vector.load %arg1[%c288, %c0_77] : memref<392x64xbf16, #tpu.memory_space<vmem>>, vector<64x32xbf16>
    %272 = arith.extf %271 : vector<64x32xbf16> to vector<64x32xf32>
    %cst_78 = arith.constant dense<0.000000e+00> : vector<2x32xf32>
    %273 = tpu.matmul %270, %272, %cst_78 {dimension_numbers = #tpu.dot_dimension_numbers<[1], [0], [0], [1], [0, 0, 1, 1], [], []>} : vector<2x64xf32>, vector<64x32xf32>, vector<2x32xf32> -> vector<2x32xf32>
    %c378 = arith.constant 378 : index
    %c0_79 = arith.constant 0 : index
    %274 = vector.load %arg1[%c378, %c0_79] : memref<392x64xbf16, #tpu.memory_space<vmem>>, vector<1x32xbf16>
    %275 = arith.extf %274 : vector<1x32xbf16> to vector<1x32xf32>
    %276 = vector.broadcast %275 : vector<1x32xf32> to vector<2x32xf32>
    %277 = arith.addf %273, %276 : vector<2x32xf32>
    %cst_80 = arith.constant 5.000000e-01 : f32
    %278 = vector.broadcast %cst_80 : f32 to vector<2x32xf32>
    %279 = arith.mulf %278, %277 : vector<2x32xf32>
    %cst_81 = arith.constant 4.471500e-02 : f32
    %280 = vector.broadcast %cst_81 : f32 to vector<2x32xf32>
    %281 = arith.mulf %280, %277 : vector<2x32xf32>
    %282 = arith.mulf %281, %277 : vector<2x32xf32>
    %283 = arith.mulf %282, %277 : vector<2x32xf32>
    %284 = arith.addf %277, %283 : vector<2x32xf32>
    %cst_82 = arith.constant 0.797884583 : f32
    %285 = vector.broadcast %cst_82 : f32 to vector<2x32xf32>
    %286 = arith.mulf %285, %284 : vector<2x32xf32>
    %287 = math.tanh %286 : vector<2x32xf32>
    %cst_83 = arith.constant 1.000000e+00 : f32
    %288 = vector.broadcast %cst_83 : f32 to vector<2x32xf32>
    %289 = arith.addf %288, %287 : vector<2x32xf32>
    %290 = arith.mulf %279, %289 : vector<2x32xf32>
    %291 = arith.addf %250, %290 : vector<2x32xf32>
    %c383 = arith.constant 383 : index
    %c0_84 = arith.constant 0 : index
    %292 = vector.load %arg1[%c383, %c0_84] : memref<392x64xbf16, #tpu.memory_space<vmem>>, vector<1x32xbf16>
    %293 = arith.extf %292 : vector<1x32xbf16> to vector<1x32xf32>
    %c388 = arith.constant 388 : index
    %c0_85 = arith.constant 0 : index
    %294 = vector.load %arg1[%c388, %c0_85] : memref<392x64xbf16, #tpu.memory_space<vmem>>, vector<1x32xbf16>
    %295 = arith.extf %294 : vector<1x32xbf16> to vector<1x32xf32>
    %cst_86 = arith.constant dense<0.000000e+00> : vector<2xf32>
    %296 = vector.multi_reduction <add>, %291, %cst_86 [1] : vector<2x32xf32> to vector<2xf32>
    %297 = vector.shape_cast %296 : vector<2xf32> to vector<2x1xf32>
    %cst_87 = arith.constant 3.200000e+01 : f32
    %298 = vector.broadcast %cst_87 : f32 to vector<2x1xf32>
    %299 = arith.divf %297, %298 : vector<2x1xf32>
    %300 = arith.mulf %291, %291 : vector<2x32xf32>
    %cst_88 = arith.constant dense<0.000000e+00> : vector<2xf32>
    %301 = vector.multi_reduction <add>, %300, %cst_88 [1] : vector<2x32xf32> to vector<2xf32>
    %302 = vector.shape_cast %301 : vector<2xf32> to vector<2x1xf32>
    %cst_89 = arith.constant 3.200000e+01 : f32
    %303 = vector.broadcast %cst_89 : f32 to vector<2x1xf32>
    %304 = arith.divf %302, %303 : vector<2x1xf32>
    %305 = arith.mulf %299, %299 : vector<2x1xf32>
    %306 = arith.subf %304, %305 : vector<2x1xf32>
    %307 = vector.broadcast %299 : vector<2x1xf32> to vector<2x32xf32>
    %308 = arith.subf %291, %307 : vector<2x32xf32>
    %cst_90 = arith.constant 9.99999974E-6 : f32
    %309 = vector.broadcast %cst_90 : f32 to vector<2x1xf32>
    %310 = arith.addf %306, %309 : vector<2x1xf32>
    %311 = math.rsqrt %310 : vector<2x1xf32>
    %312 = vector.broadcast %311 : vector<2x1xf32> to vector<2x32xf32>
    %313 = arith.mulf %308, %312 : vector<2x32xf32>
    %314 = vector.broadcast %293 : vector<1x32xf32> to vector<2x32xf32>
    %315 = arith.mulf %313, %314 : vector<2x32xf32>
    %316 = vector.broadcast %295 : vector<1x32xf32> to vector<2x32xf32>
    %317 = arith.addf %315, %316 : vector<2x32xf32>
    %cst_91 = arith.constant 0.000000e+00 : f32
    %318 = vector.broadcast %cst_91 : f32 to vector<2x64xf32>
    %319 = tpu.concatenate %110, %317, %318 in 1 : vector<2x32xf32>, vector<2x32xf32>, vector<2x64xf32> -> vector<2x128xf32>
    %cst_92 = arith.constant 0.000000e+00 : f32
    %320 = vector.broadcast %cst_92 : f32 to vector<6x128xf32>
    %321 = tpu.concatenate %319, %320 in 0 : vector<2x128xf32>, vector<6x128xf32> -> vector<8x128xf32>
    %c0_93 = arith.constant 0 : index
    %c0_94 = arith.constant 0 : index
    %322 = vector.load %arg2[%c0_93, %c0_94] : memref<8x128xf32, #tpu.memory_space<vmem>>, vector<8x128xf32>
    tpu.vector_store %arg2[%c0_93, %c0_94], %321 {strides = array<i32>} : memref<8x128xf32, #tpu.memory_space<vmem>>, vector<8x128xf32>,
    return
  }
}

</mosaic_0001>

<bundles_post_ra>
// kernel: decoder_layer_step.1
= control target key start
LH: loop header
LB: loop body
LE: loop exit
PB: predicated region body
PF: predicated region fallthrough
CT: control target
= control target key end

     0   :  { %v17_v0 = vlaneseq  ;;  %vm22_vm0 = vcmask 517120   ;;  %v1710_v9 = vmov 0   ;;  %v1711_v22 = vmov 0.0|0.0   ;;  %s1712_s21 = smov 96   ;;  %s1715_s23 = smov 32   ;;  %s2085_s1 = inlined_call_operand.vmem [shape: bf16[392,64], index: 1, kind: input, shape index: {}]   ;;  %s2086_s0 = inlined_call_operand.vmem [shape: f32[20,128], index: 0, kind: input, shape index: {}]   ;;  %s2087_s2 = inlined_call_operand.vmem [shape: f32[8,128], index: 2, kind: output, shape index: {}]  }
   0x1   :  { %v1735_v1 = vld [vmem:[%s2085_s1 + $0xb8] sm:$0x1]  ;;  %v1746_v5 = vld [vmem:[%s2086_s0 + $0x10] sm:$0x3]  ;;  %1672 = vset.pattern.permute.xlu1 %v1710_v9  ;;  %1671 = vset.pattern.permute.xlu0 %v1710_v9  ;;  %v1755_v10 = vld [vmem:[%s2085_s1 + $0xc0] sm:$0x4] }
   0x2   :  { %v16_v2 = vunpack.c.l.bf16 %v1735_v1  ;;  %v1738_v3 = vshrl.u32 %v17_v0, 7  ;;  %v27_v11 = vunpack.c.l.bf16 %v1755_v10  ;;  %v1291_v21 = vld [vmem:[%s2085_s1] sm:$0xff]   ;;  %1589 = vmatprep.subr.bf16.mxu0 %v1711_v22  ;;  %1607 = vmatprep.subr.bf16.mxu1 %v1711_v22  ;;  %v1382_v23 = vld [vmem:[%s2085_s1 + $0x8] sm:$0xff]   ;;  %v1383_v24 = vld [vmem:[%s2085_s1 + $0x10] sm:$0xff]   ;;  %vm1713_vm1 = vmmov 0  }
   0x3   :  { %1591 = vmatpush3.bf16.msra.mxu0 %v1291_v21  ;;  %v1384_v27 = vld [vmem:[%s2085_s1 + $0x18] sm:$0xff]   ;;  %v1714_v28 = vmov 0.0   ;;  %v14_v33 = vld [vmem:[%s2086_s0 + $0x12] sm:$0x3]  ;;  %vm61_vm2 = vcmask 261120   ;;  %vm85_vm3 = vcmask 523264  }
   0x4   :  { %v1741_v4 = vsub.s32 0, %v1738_v3  ;;  %v1759_v12 = vsub.s32 5, %v1738_v3  ;;  %1592 = vmatprep.subr.bf16.mxu0 %v1711_v22  ;;  %1479 = vmatprep.mubr.msk.f32.mxu0 %vm1713_vm1, %v1714_v28  ;;  %v1803_v36 = vld [vmem:[%s2085_s1 + $0xb8] sm:$0x2]  ;;  %v1807_v38 = vsub.s32 3, %v1738_v3  ;;  %vm169_vm4 = vcmask 254976   ;;  %vm1635_vm5 = vmpackc.low %vm61_vm2, %vm61_vm2 }
   0x5   :  { %1509 = vmatprep.mubr.msk.f32.mxu1 %vm1713_vm1, %v1714_v28  ;;  %v80_v37 = vunpack.c.l.bf16 %v1803_v36  ;;  %v1385_v50 = vld [vmem:[%s2085_s1 + $0x20] sm:$0xff]   ;;  %v1386_v51 = vld [vmem:[%s2085_s1 + $0x28] sm:$0xff]   ;;  %v1387_v52 = vld [vmem:[%s2085_s1 + $0x30] sm:$0xff]   ;;  %v1863_v21 = vsub.s32 4, %v1738_v3  ;;  %vm641_vm6 = vcmask 1043456   ;;  %vm723_vm7 = vcmask 130048  }
   0x6   :  { %v20_v6 = vrot.slane %v16_v2, %v1741_v4  ;;  %v1764_v13 = vrot.slane %v27_v11, %v1759_v12  ;;  %1609 = vmatpush3.bf16.msra.mxu1 %v1387_v52  ;;  %v1388_v53 = vld [vmem:[%s2085_s1 + $0x38] sm:$0xff]   ;;  %v1389_v54 = vld [vmem:[%s2085_s1 + $0x40] sm:$0xff]   ;;  %vm815_vm8 = vcmask 257024   ;;  %vm833_vm9 = vcmask 1040384  }
   0x7   :  { %1594 = vmatpush3.bf16.msra.mxu0 %v1382_v23  ;;  %v84_v39 = vrot.slane %v80_v37, %v1807_v38  ;;  %1610 = vmatprep.subr.bf16.mxu1 %v1711_v22  ;;  %v1837_v62 = vld [vmem:[%s2085_s1 + $0xbc] sm:$0x2]  ;;  %v1842_v63 = vld [vmem:[%s2085_s1 + $0xc0] sm:$0x1]  ;;  %vm1267_vm10 = vcmask 1041408  }
   0x8   :  { %v21_v7 = vmul.f32 %v20_v6, %v1746_v5  ;;  %1595 = vmatprep.subr.bf16.mxu0 %v1711_v22  ;;  %v166_v0 = vunpack.c.l.bf16 %v1837_v62  ;;  %v168_v6 = vunpack.c.l.bf16 %v1842_v63 }
   0xa   :  { %v23_v8 = vsel %vm22_vm0, %v21_v7, 0.0  ;;  %1612 = vmatpush3.bf16.msra.mxu1 %v1388_v53  ;;  %v189_v7 = vrot.slane %v166_v0, %v1807_v38 }
   0xb   :  { %24 = vadd.xlane.f32.xlu0 %v23_v8  ;;  %1597 = vmatpush3.bf16.msra.mxu0 %v1383_v24 }
   0xc   :  { %1598 = vmatprep.subr.bf16.mxu0 %v1711_v22  ;;  %1613 = vmatprep.subr.bf16.mxu1 %v1711_v22 }
   0xe   :  { %1615 = vmatpush3.bf16.msra.mxu1 %v1389_v54 }
   0xf   :  { %1600 = vmatpush3.bf16.msra.mxu0 %v1384_v27  ;;  %1616 = vmatprep.subr.bf16.mxu1 %v1711_v22 }
  0x10   :  { %1601 = vmatprep.subr.bf16.mxu0 %v1711_v22 }
  0x98   :  { %v25_v14 = vpop.xlane.xlu0 %24 }
  0x99   :  { %v32_v15 = vadd.f32 %v1764_v13, %v25_v14 }
  0x9b   :  { %v1274_v16 = vmul.f32 -1.442695, %v32_v15  ;;  %v194_v15 = vrot.slane %v168_v6, %v1741_v4 }
  0x9d   :  { %1680 = vpow2.f32 %v1274_v16 }
  0xa7   :  { %v1681_v17 = vpop.eup %1680 }
  0xa8   :  { %v36_v18 = vadd.f32 1.0, %v1681_v17 }
  0xaa   :  { %1682 = vrcp.f32 %v36_v18  ;;  %v1390_v18 = vld [vmem:[%s2085_s1 + $0x48] sm:$0xff]  }
  0xab   :  { %1618 = vmatpush3.bf16.msra.mxu1 %v1390_v18  ;;  %v458_v18 = vsub.s32 6, %v1738_v3 }
  0xac   :  { %1633 = vmatprep.subr.bf16.mxu1 %v1711_v22 }
  0xb4   :  { %v1683_v19 = vpop.eup %1682 }
  0xb5   :  { %41 = vperm.xlu1 %1672, %v1683_v19   ;;  %v45_v20 = vsub.f32 1.0, %v1683_v19  ;;  %v204_v19 = vld [vmem:[%s2085_s1 + $0xb8] sm:$0x4] }
  0xb7   :  { %48 = vperm.xlu0 %1671, %v45_v20   ;;  %v205_v20 = vunpack.c.l.bf16 %v204_v19 }
  0xb9   :  { %v209_v23 = vrot.slane %v205_v20, %v1863_v21  ;;  %v302_v27 = vrot.slane %v205_v20, %v1759_v12 }
 0x134   :  { %v42_v29 = vpop.permute.xlu1 %41 }
 0x135   :  { %v44_v30 = vmul.f32 %v42_v29, %v1746_v5 }
 0x136   :  { %v49_v25 = vpop.permute.xlu0 %48 }
 0x137   :  { %v51_v26 = vmul.f32 %v49_v25, %v1746_v5 }
 0x139   :  { %53 = vrot.lane.b32.xlu1 %v51_v26, %s1712_s21 }
 0x1ab   :  { %v54_v31 = vpop.permute.xlu1 %53 }
 0x1ac   :  { %v56_v32 = vadd.f32 %v54_v31, %v44_v30 }
 0x1ae   :  { %58 = vrot.lane.b32.xlu1 %v56_v32, %s1712_s21 }
 0x220   :  { %v59_v34 = vpop.permute.xlu1 %58 }
 0x221   :  { %v62_v35 = vsel %vm61_vm2, %v14_v33, %v59_v34 }
 0x222   :  { %1480 = vmatmul.mubr.msk.f32.vlgmr.msra.gmra.mrb[0].mxu0 %vm85_vm3, %v62_v35 }
 0x223   :  { %1490 = vmatprep.mubr.msk.f32.mxu0 %vm1713_vm1, %v1714_v28  ;;  %1603 = vmatpush3.bf16.msra.mxu0 %v1385_v50 }
 0x224   :  { %1604 = vmatprep.subr.bf16.mxu0 %v1711_v22 }
 0x227   :  { %1606 = vmatpush3.bf16.msra.mxu0 %v1386_v51 }
 0x228   :  { %1619 = vmatprep.subr.bf16.mxu0 %v1711_v22 }
 0x2f5   :  { %v155_v40 = vpop.f32.mrb[0].mxu0 }
 0x2f6   :  { %v156_v41 = vadd.f32 %v155_v40, %v84_v39  ;;  %v1481_v42 = vpop.f32.mrb[1].mxu0 }
 0x2f7   :  { %v1892_v42 = vld [vmem:[%s2085_s1 + $0xc0] sm:$0x2] }
 0x2f8   :  { %v1276_v43 = vmul.f32 -1.442695, %v156_v41 }
 0x2fa   :  { %1684 = vpow2.f32 %v1276_v43 }
 0x304   :  { %v1685_v44 = vpop.eup %1684 }
 0x305   :  { %v162_v45 = vadd.f32 1.0, %v1685_v44  ;;  %v405_v44 = vunpack.c.l.bf16 %v1892_v42 }
 0x307   :  { %1686 = vrcp.f32 %v162_v45  ;;  %v1899_v45 = vsub.s32 2, %v1738_v3 }
 0x311   :  { %v1687_v46 = vpop.eup %1686 }
 0x312   :  { %v170_v47 = vsel %vm169_vm4, %v1687_v46, 0.0  ;;  %v175_v48 = vmul.f32 %v1687_v46, %v1687_v46 }
 0x313   :  { %171 = vadd.xlane.f32.xlu1 %v170_v47  ;;  %v1391_v47 = vld [vmem:[%s2085_s1 + $0x50] sm:$0xff]  }
 0x314   :  { %v176_v49 = vsel %vm169_vm4, %v175_v48, 0.0  ;;  %v1393_v48 = vld [vmem:[%s2085_s1 + $0x60] sm:$0xff]  }
 0x315   :  { %177 = vadd.xlane.f32.xlu0 %v176_v49 }
 0x3a0   :  { %v172_v55 = vpop.xlane.xlu1 %171 }
 0x3a1   :  { %v174_v56 = vmul.f32 0.03125, %v172_v55 }
 0x3a2   :  { %v178_v57 = vpop.xlane.xlu0 %177 }
 0x3a3   :  { %v180_v58 = vmul.f32 %v174_v56, %v174_v56  ;;  %v179_v59 = vmul.f32 0.03125, %v178_v57  ;;  %v182_v8 = vsub.f32 %v1687_v46, %v174_v56  ;;  %v440_v46 = vrot.slane %v405_v44, %v1899_v45 }
 0x3a5   :  { %v181_v60 = vsub.f32 %v179_v59, %v180_v58 }
 0x3a7   :  { %v183_v61 = vadd.f32 1e-05, %v181_v60 }
 0x3a9   :  { %1688 = vrsqrt.f32 %v183_v61 }
 0x3b3   :  { %v1689_v9 = vpop.eup %1688 }
 0x3b4   :  { %v185_v14 = vmul.f32 %v1689_v9, %v182_v8  ;;  %v11_v8 = vld [vmem:[%s2086_s0] sm:$0xff] }
 0x3b6   :  { %v190_v16 = vmul.f32 %v189_v7, %v185_v14  ;;  %v1394_v14 = vld [vmem:[%s2085_s1 + $0x68] sm:$0xff]  }
 0x3b8   :  { %v195_v17 = vadd.f32 %v194_v15, %v190_v16  ;;  %v12_v15 = vld [vmem:[%s2086_s0 + $0x8] sm:$0xff]  ;;  %v454_v16 = vld [vmem:[%s2085_s1 + $0xb8] sm:$0x8] }
 0x3ba   :  { %1491 = vmatmul.mubr.msk.f32.vlgmr.msra.gmra.mrb[2].mxu0 %vm61_vm2, %v195_v17  ;;  %v455_v17 = vunpack.c.l.bf16 %v454_v16 }
 0x3bb   :  { %1520 = vmatprep.mubr.msk.f32.mxu0 %vm1713_vm1, %v1714_v28  ;;  %1621 = vmatpush3.bf16.msra.mxu0 %v1391_v47 }
 0x3bc   :  { %1622 = vmatprep.subr.bf16.mxu0 %v1711_v22  ;;  %v459_v19 = vrot.slane %v455_v17, %v458_v18 }
 0x48d   :  { %v279_v24 = vpop.f32.mrb[2].mxu0 }
 0x48e   :  { %v280_v25 = vadd.f32 %v279_v24, %v209_v23  ;;  %v1492_v26 = vpop.f32.mrb[3].mxu0  ;;  %v546_v24 = vsub.s32 7, %v1738_v3 }
 0x490   :  { %1510 = vmatmul.mubr.msk.f32.vlgmr.msra.gmra.mrb[0].mxu1 %vm85_vm3, %v280_v25  ;;  %v547_v26 = vrot.slane %v455_v17, %v546_v24  ;;  %v1396_v17 = vld [vmem:[%s2085_s1 + $0x70] sm:$0xff]  }
 0x491   :  { %1538 = vmatprep.mubr.msk.f32.mxu1 %vm1713_vm1, %v1714_v28 }
 0x563   :  { %v372_v29 = vpop.f32.mrb[0].mxu1 }
 0x564   :  { %v373_v30 = vadd.f32 %v372_v29, %v302_v27  ;;  %v1511_v31 = vpop.f32.mrb[1].mxu1  ;;  %v1946_v27 = vsub.s32 1, %v1738_v3 }
 0x566   :  { %v1871_v32 = vadd.f32 %v373_v30, %v1746_v5  ;;  %v1886_v5 = vld [vmem:[%s2085_s1 + $0xbc] sm:$0x4] }
 0x567   :  { %v378_v41 = vunpack.c.l.bf16 %v1886_v5 }
 0x568   :  { %407 = vrot.lane.b32.xlu1 %v1871_v32, %s1712_s21  ;;  %v1877_v33 = vmul.f32 %v1871_v32, %v1871_v32 }
 0x569   :  { %v431_v43 = vrot.slane %v378_v41, %v1759_v12  ;;  %v1392_v12 = vld [vmem:[%s2085_s1 + $0x58] sm:$0xff]  }
 0x56a   :  { %1624 = vmatpush3.bf16.msra.mxu0 %v1392_v12 }
 0x56b   :  { %1626 = vmatprep.subr.bf16.mxu0 %v1393_v48 }
 0x56c   :  { %415 = vrot.lane.b32.xlu1 %v1877_v33, %s1712_s21 }
 0x5da   :  { %v408_v34 = vpop.permute.xlu1 %407 }
 0x5db   :  { %v410_v35 = vsel %vm169_vm4, %v408_v34, 0.0 }
 0x5dc   :  { %411 = vadd.xlane.f32.xlu1 %v410_v35 }
 0x5de   :  { %v416_v39 = vpop.permute.xlu1 %415 }
 0x5df   :  { %v418_v40 = vsel %vm169_vm4, %v416_v39, 0.0  ;;  %v1395_v39 = vld [vmem:[%s2085_s1 + $0xb0] sm:$0xff]  }
 0x5e0   :  { %419 = vadd.xlane.f32.xlu0 %v418_v40  ;;  %v1348_v12 = vunpack.c.l.bf16 %v1395_v39 }
 0x5f6   :  { %433 = vrot.lane.b32.xlu0 %v431_v43, %s1715_s23 }
 0x5fa   :  { %442 = vrot.lane.b32.xlu0 %v440_v46, %s1715_s23 }
 0x669   :  { %v412_v49 = vpop.xlane.xlu1 %411 }
 0x66a   :  { %v413_v50 = vmul.f32 0.03125, %v412_v49 }
 0x66c   :  { %v422_v52 = vmul.f32 %v413_v50, %v413_v50  ;;  %v424_v57 = vsub.f32 %v1871_v32, %v413_v50  ;;  %v1349_v50 = vunpack.c.h.bf16 %v1395_v39 }
 0x66d   :  { %v420_v51 = vpop.xlane.xlu0 %419 }
 0x66e   :  { %v421_v53 = vmul.f32 0.03125, %v420_v51 }
 0x670   :  { %v423_v54 = vsub.f32 %v421_v53, %v422_v52 }
 0x671   :  { %v434_v56 = vpop.permute.xlu0 %433 }
 0x672   :  { %v425_v55 = vadd.f32 1e-05, %v423_v54 }
 0x674   :  { %1690 = vrsqrt.f32 %v425_v55 }
 0x675   :  { %v443_v60 = vpop.permute.xlu0 %442 }
 0x67e   :  { %v1691_v58 = vpop.eup %1690 }
 0x67f   :  { %v427_v59 = vmul.f32 %v1691_v58, %v424_v57 }
 0x681   :  { %v436_v61 = vmul.f32 %v434_v56, %v427_v59 }
 0x683   :  { %v1917_v7 = vadd.f32 %v443_v60, %v436_v61 }
 0x685   :  { %461 = vrot.lane.b32.xlu1 %v1917_v7, %s1712_s21 }
 0x6f7   :  { %v462_v9 = vpop.permute.xlu1 %461 }
 0x6f8   :  { %1521 = vmatmul.mubr.msk.f32.vlgmr.msra.gmra.mrb[4].mxu0 %vm61_vm2, %v462_v9 }
 0x6f9   :  { %1628 = vmatpush3.bf16.msra.mxu0 %v1393_v48  ;;  %1531 = vmatprep.mubr.msk.f32.mxu0 %vm61_vm2, %v11_v8 }
 0x6fa   :  { %1630 = vmatprep.subr.bf16.mxu0 %v1394_v14 }
 0x6fd   :  { %1632 = vmatpush3.bf16.msra.mxu0 %v1394_v14 }
 0x6fe   :  { %1637 = vmatprep.subr.bf16.mxu0 %v1711_v22 }
 0x700   :  { %1532 = vmatmul.mubr.msk.f32.vlgmr.msra.gmra.mrb[6].mxu0 %vm61_vm2, %v12_v15 }
 0x701   :  { %1545 = vmatprep.mubr.msk.f32.mxu0 %vm1713_vm1, %v1714_v28 }
 0x7cb   :  { %v531_v20 = vpop.f32.mrb[4].mxu0 }
 0x7cc   :  { %v1522_v23 = vpop.f32.mrb[5].mxu0  ;;  %v532_v25 = vadd.f32 %v531_v20, %v459_v19  ;;  %v1397_v19 = vld [vmem:[%s2085_s1 + $0x78] sm:$0xff]  }
 0x7ce   :  { %v535_v29 = vmul.f32 0.35355338, %v532_v25 }
 0x7d0   :  { %v636_v40 = vrot.slane %v535_v29, %v1741_v4  ;;  %v640_v43 = vrot.slane %v535_v29, %v1946_v27 }
 0x7d2   :  { %v642_v48 = vsel %vm641_vm6, %v636_v40, %v640_v43 }
 0x7d3   :  { %v1533_v30 = vpop.f32.mrb[6].mxu0  ;;  %v643_v49 = vmul.f32 %v1348_v12, %v642_v48 }
 0x7d4   :  { %v626_v31 = vadd.f32 %v1533_v30, %v547_v26  ;;  %v620_v34 = vpop.f32.mrb[7].mxu0 }
 0x7d5   :  { %v621_v35 = vadd.f32 %v620_v34, %v547_v26 }
 0x7d7   :  { %v1673_v46 = vpack.i.bf16 %v626_v31, %v621_v35  ;;  %v1634_v47 = vpack.c.bf16 %v626_v31, %v621_v35 }
 0x7d9   :  { %1636 = vmatpush3.bf16.xpose.msk.msra.mxu1 %vm1635_vm5, %v1634_v47 }
 0x7da   :  { %1640 = vmatprep.subr.bf16.mxu1 %v1711_v22 }
 0x7e0   :  { %1539 = vmatmul.mubr.msk.f32.vlgmr.msra.gmra.mrb[2].mxu1 %vm61_vm2, %v643_v49 }
 0x7e1   :  { %1556 = vmatprep.mubr.msk.f32.mxu1 %vm1713_vm1, %v1714_v28  ;;  %1642 = vmatpush3.bf16.msra.mxu1 %v1396_v17  ;;  %v982_v17 = vrot.slane %v80_v37, %v1899_v45 }
 0x7e2   :  { %1643 = vmatprep.subr.bf16.mxu1 %v1711_v22 }
 0x7e5   :  { %1645 = vmatpush3.bf16.msra.mxu1 %v1397_v19 }
 0x7e6   :  { %1652 = vmatprep.subr.bf16.mxu1 %v1711_v22 }
 0x8b3   :  { %v719_v51 = vpop.f32.mrb[2].mxu1 }
 0x8b4   :  { %v720_v52 = vadd.f32 %v1349_v50, %v719_v51  ;;  %v1540_v53 = vpop.f32.mrb[3].mxu1 }
 0x8b6   :  { %v724_v54 = vsel %vm723_vm7, %v720_v52, -inf }
 0x8b7   :  { %725 = vmax.xlane.f32.xlu0 %v724_v54 }
 0x8cd   :  { %1674 = vrot.lane.b32.xlu0 %v1673_v46, %s1712_s21 }
 0x944   :  { %v726_v55 = vpop.xlane.xlu0 %725 }
 0x945   :  { %v727_v56 = vsub.f32 %v720_v52, %v726_v55 }
 0x947   :  { %v728_v57 = vmul.f32 1.442695, %v727_v56 }
 0x948   :  { %v1675_v58 = vpop.permute.xlu0 %1674 }
 0x949   :  { %1692 = vpow2.f32 %v728_v57  ;;  %v1677_v59 = vunpack.i.h.bf16 %v1675_v58  ;;  %v1676_v60 = vunpack.i.l.bf16 %v1675_v58 }
 0x94b   :  { %v1638_v61 = vpack.c.bf16 %v1677_v59, %v1676_v60 }
 0x94d   :  { %1639 = vmatpush3.bf16.msra.mxu0 %v1638_v61 }
 0x94e   :  { %1646 = vmatprep.subr.bf16.mxu0 %v1711_v22 }
 0x953   :  { %v1693_v8 = vpop.eup %1692 }
 0x954   :  { %v730_v9 = vsel %vm723_vm7, %v1693_v8, 0.0 }
 0x955   :  { %731 = vadd.xlane.f32.xlu1 %v730_v9  ;;  %v1998_v9 = vld [vmem:[%s2085_s1 + $0xbc] sm:$0x8] }
 0x9e2   :  { %v732_v14 = vpop.xlane.xlu1 %731 }
 0x9e3   :  { %1694 = vrcp.f32 %v732_v14  ;;  %v964_v14 = vrot.slane %v405_v44, %v1807_v38 }
 0x9ed   :  { %v1695_v15 = vpop.eup %1694 }
 0x9ee   :  { %v734_v16 = vmul.f32 %v1695_v15, %v1693_v8 }
 0x9f0   :  { %1546 = vmatmul.mubr.msk.f32.vlgmr.msra.gmra.mrb[8].mxu0 %vm723_vm7, %v734_v16  ;;  %v973_v16 = vrot.slane %v16_v2, %v1946_v27 }
 0x9f1   :  { %1567 = vmatprep.mubr.msk.f32.mxu0 %vm1713_vm1, %v1714_v28 }
 0xac3   :  { %v810_v20 = vpop.f32.mrb[8].mxu0 }
 0xac4   :  { %v814_v23 = vmul.f32 %v1348_v12, %v810_v20  ;;  %v1547_v25 = vpop.f32.mrb[9].mxu0  ;;  %v1980_v12 = vld [vmem:[%s2085_s1 + $0xbc] sm:$0x1] }
 0xac5   :  { %v844_v53 = vunpack.c.l.bf16 %v1980_v12  ;;  %v1136_v12 = vrot.slane %v166_v0, %v1899_v45  ;;  %v379_v0 = vsel %vm169_vm4, %v1871_v32, 0.0 }
 0xac6   :  { %v816_v26 = vsel %vm815_vm8, %v814_v23, 0.0  ;;  %v824_v29 = vrot.slane %v814_v23, 4 }
 0xac7   :  { %v817_v30 = vrot.slane %v816_v26, 4  ;;  %v848_v54 = vrot.slane %v844_v53, %v1741_v4 }
 0xac8   :  { %v826_v31 = vsel %vm815_vm8, %v824_v29, 0.0 }
 0xac9   :  { %v818_v34 = vadd.f32 %v817_v30, %v816_v26  ;;  %v827_v35 = vrot.slane %v826_v31, 4 }
 0xacb   :  { %v819_v39 = vrot.slane %v818_v34, 2  ;;  %v828_v40 = vadd.f32 %v827_v35, %v826_v31 }
 0xacd   :  { %v820_v43 = vadd.f32 %v819_v39, %v818_v34  ;;  %v829_v46 = vrot.slane %v828_v40, 2 }
 0xacf   :  { %v821_v47 = vrot.slane %v820_v43, 1  ;;  %v830_v48 = vadd.f32 %v829_v46, %v828_v40  ;;  %v384_v46 = vsel %vm169_vm4, %v1877_v33, 0.0  ;;  %v1398_v33 = vld [vmem:[%s2085_s1 + $0x80] sm:$0xff]  }
 0xad0   :  { %1648 = vmatpush3.bf16.msra.mxu0 %v1398_v33 }
 0xad1   :  { %v831_v49 = vrot.slane %v830_v48, 1  ;;  %v822_v50 = vadd.f32 %v821_v47, %v820_v43  ;;  %v1716_v47 = vmov 1   ;;  %1649 = vmatprep.subr.bf16.mxu0 %v1711_v22 }
 0xad2   :  { %1678 = vset.pattern.permute.xlu1 %v1716_v47  ;;  %1679 = vset.pattern.permute.xlu0 %v1716_v47 }
 0xad3   :  { %v832_v51 = vadd.f32 %v831_v49, %v830_v48 }
 0xad5   :  { %v834_v52 = vsel %vm833_vm9, %v822_v50, %v832_v51 }
 0xad6   :  { %1557 = vmatmul.mubr.msk.f32.vlgmr.msra.gmra.mrb[4].mxu1 %vm61_vm2, %v834_v52 }
 0xad7   :  { %1586 = vmatprep.mubr.msk.f32.mxu1 %vm1713_vm1, %v1714_v28 }
 0xba9   :  { %v918_v55 = vpop.f32.mrb[4].mxu1 }
 0xbaa   :  { %v1986_v56 = vadd.f32 %v918_v55, %v848_v54  ;;  %v1558_v57 = vpop.f32.mrb[5].mxu1 }
 0xbac   :  { %923 = vrot.lane.b32.xlu1 %v1986_v56, %s1715_s23  ;;  %v983_v38 = vmul.f32 %v982_v17, %v1986_v56 }
 0xc1e   :  { %v924_v58 = vpop.permute.xlu1 %923 }
 0xc1f   :  { %v926_v28 = vadd.f32 %v924_v58, %v1917_v7  ;;  %v928_v7 = vunpack.c.l.bf16 %v1998_v9 }
 0xc21   :  { %930 = vrot.lane.b32.xlu0 %v926_v28, %s1712_s21  ;;  %v937_v59 = vmul.f32 %v926_v28, %v926_v28  ;;  %v955_v15 = vrot.slane %v928_v7, %v458_v18 }
 0xc25   :  { %939 = vrot.lane.b32.xlu0 %v937_v59, %s1712_s21 }
 0xc93   :  { %v931_v60 = vpop.permute.xlu0 %930 }
 0xc94   :  { %v933_v61 = vsel %vm169_vm4, %v931_v60, 0.0 }
 0xc95   :  { %934 = vadd.xlane.f32.xlu0 %v933_v61 }
 0xc97   :  { %v940_v4 = vpop.permute.xlu0 %939 }
 0xc98   :  { %v942_v8 = vsel %vm169_vm4, %v940_v4, 0.0 }
 0xc99   :  { %943 = vadd.xlane.f32.xlu1 %v942_v8  ;;  %v1400_v8 = vld [vmem:[%s2085_s1 + $0x90] sm:$0xff]  }
 0xc9a   :  { %1654 = vmatpush3.bf16.msra.mxu1 %v1400_v8  ;;  %v397_v8 = vrot.slane %v378_v41, %v1863_v21 }
 0xc9b   :  { %1655 = vmatprep.subr.bf16.mxu1 %v1711_v22 }
 0xcaa   :  { %966 = vrot.lane.b32.xlu1 %v964_v14, %s1715_s23  ;;  %v1402_v14 = vld [vmem:[%s2085_s1 + $0xa0] sm:$0xff]  }
 0xcab   :  { %957 = vrot.lane.b32.xlu0 %v955_v15, %s1715_s23  ;;  %v1403_v15 = vld [vmem:[%s2085_s1 + $0xa8] sm:$0xff]  }
 0xcaf   :  { %975 = vrot.lane.b32.xlu0 %v973_v16, %s1715_s23  ;;  %v1032_v16 = vrot.slane %v844_v53, %v1946_v27 }
 0xcb3   :  { %985 = vrot.lane.b32.xlu0 %v983_v38, %s1715_s23 }
 0xd22   :  { %v935_v42 = vpop.xlane.xlu0 %934 }
 0xd23   :  { %v936_v44 = vmul.f32 0.03125, %v935_v42 }
 0xd25   :  { %v946_v19 = vmul.f32 %v936_v44, %v936_v44  ;;  %v948_v2 = vsub.f32 %v926_v28, %v936_v44 }
 0xd26   :  { %v944_v18 = vpop.xlane.xlu1 %943  ;;  %v958_v1 = vpop.permute.xlu0 %957 }
 0xd27   :  { %v945_v20 = vmul.f32 0.03125, %v944_v18 }
 0xd29   :  { %v947_v23 = vsub.f32 %v945_v20, %v946_v19 }
 0xd2a   :  { %v976_v36 = vpop.permute.xlu0 %975  ;;  %v967_v37 = vpop.permute.xlu1 %966 }
 0xd2b   :  { %v949_v25 = vadd.f32 1e-05, %v947_v23 }
 0xd2d   :  { %1696 = vrsqrt.f32 %v949_v25 }
 0xd2e   :  { %v986_v35 = vpop.permute.xlu0 %985 }
 0xd37   :  { %v1697_v26 = vpop.eup %1696 }
 0xd38   :  { %v951_v29 = vmul.f32 %v1697_v26, %v948_v2 }
 0xd3a   :  { %v960_v30 = vmul.f32 %v958_v1, %v951_v29 }
 0xd3c   :  { %v969_v31 = vadd.f32 %v967_v37, %v960_v30 }
 0xd3e   :  { %v978_v34 = vmul.f32 %v976_v36, %v969_v31 }
 0xd40   :  { %v988_v39 = vadd.f32 %v986_v35, %v978_v34 }
 0xd42   :  { %990 = vrot.lane.b32.xlu1 %v988_v39, %s1712_s21 }
 0xdb4   :  { %v991_v40 = vpop.permute.xlu1 %990 }
 0xdb5   :  { %v993_v43 = vsel %vm169_vm4, %v991_v40, 0.0 }
 0xdb6   :  { %994 = vadd.xlane.f32.xlu0 %v993_v43 }
 0xdba   :  { %385 = vadd.xlane.f32.xlu0 %v384_v46 }
 0xe43   :  { %v995_v48 = vpop.xlane.xlu0 %994 }
 0xe44   :  { %v996_v49 = vadd.f32 %v995_v48, %v1764_v13  ;;  %v1399_v13 = vld [vmem:[%s2085_s1 + $0x88] sm:$0xff]  }
 0xe45   :  { %1651 = vmatpush3.bf16.msra.mxu0 %v1399_v13 }
 0xe46   :  { %v1287_v50 = vmul.f32 -1.442695, %v996_v49 }
 0xe47   :  { %v386_v33 = vpop.xlane.xlu0 %385 }
 0xe48   :  { %1698 = vpow2.f32 %v1287_v50 }
 0xe52   :  { %v1699_v51 = vpop.eup %1698 }
 0xe53   :  { %v1000_v52 = vadd.f32 1.0, %v1699_v51  ;;  %v1250_v51 = vrot.slane %v928_v7, %v546_v24 }
 0xe55   :  { %1700 = vrcp.f32 %v1000_v52  ;;  %v1259_v52 = vrot.slane %v27_v11, %v1863_v21 }
 0xe5f   :  { %v1701_v54 = vpop.eup %1700 }
 0xe60   :  { %v1009_v55 = vsub.f32 1.0, %v1701_v54 }
 0xe62   :  { %1012 = vperm.xlu1 %1678, %v1009_v55  }
 0xe66   :  { %1005 = vperm.xlu1 %1678, %v1701_v54  }
 0xee1   :  { %v1013_v57 = vpop.permute.xlu1 %1012 }
 0xee2   :  { %v1015_v58 = vmul.f32 %v1013_v57, %v1986_v56  ;;  %v1401_v56 = vld [vmem:[%s2085_s1 + $0x98] sm:$0xff]   ;;  %v387_v57 = vmul.f32 0.03125, %v386_v33 }
 0xee3   :  { %1657 = vmatpush3.bf16.msra.mxu1 %v1401_v56 }
 0xee4   :  { %1017 = vrot.lane.b32.xlu1 %v1015_v58, %s1715_s23  ;;  %1658 = vmatprep.subr.bf16.mxu1 %v1711_v22 }
 0xee5   :  { %v1006_v28 = vpop.permute.xlu1 %1005 }
 0xee6   :  { %v1008_v59 = vmul.f32 %v1006_v28, %v969_v31 }
 0xee7   :  { %1660 = vmatpush3.bf16.msra.mxu1 %v1402_v14 }
 0xee8   :  { %1661 = vmatprep.subr.bf16.mxu1 %v1711_v22 }
 0xeeb   :  { %1663 = vmatpush3.bf16.msra.mxu1 %v1403_v15 }
 0xf56   :  { %v1018_v60 = vpop.permute.xlu1 %1017 }
 0xf57   :  { %v1020_v61 = vadd.f32 %v1018_v60, %v1008_v59 }
 0xf59   :  { %1034 = vrot.lane.b32.xlu1 %v1020_v61, %s1712_s21 }
 0xfcb   :  { %v1035_v4 = vpop.permute.xlu1 %1034 }
 0xfcc   :  { %1568 = vmatmul.mubr.msk.f32.vlgmr.msra.gmra.mrb[10].mxu0 %vm61_vm2, %v1035_v4 }
0x109f   :  { %v1104_v17 = vpop.f32.mrb[10].mxu0 }
0x10a0   :  { %v1105_v38 = vadd.f32 %v1104_v17, %v1032_v16  ;;  %v1569_v42 = vpop.f32.mrb[11].mxu0  ;;  %v402_v16 = vrot.slane %v168_v6, %v1946_v27 }
0x10a2   :  { %v1109_v44 = vmul.f32 0.044715, %v1105_v38  ;;  %v1108_v22 = vmul.f32 0.5, %v1105_v38 }
0x10a4   :  { %v1110_v18 = vmul.f32 %v1109_v44, %v1105_v38 }
0x10a6   :  { %v1111_v19 = vmul.f32 %v1110_v18, %v1105_v38 }
0x10a8   :  { %v1112_v20 = vadd.f32 %v1111_v19, %v1105_v38 }
0x10aa   :  { %v1113_v23 = vmul.f32 0.7978846, %v1112_v20 }
0x10ac   :  { %1702 = vtanh.f32 %v1113_v23 }
0x10b6   :  { %v1703_v25 = vpop.eup %1702 }
0x10b7   :  { %v1115_v1 = vadd.f32 1.0, %v1703_v25 }
0x10b9   :  { %v1116_v2 = vmul.f32 %v1115_v1, %v1108_v22 }
0x10bb   :  { %1587 = vmatmul.mubr.msk.f32.vlgmr.msra.gmra.mrb[6].mxu1 %vm85_vm3, %v1116_v2 }
0x118e   :  { %v1206_v53 = vpop.f32.mrb[6].mxu1 }
0x118f   :  { %v1207_v26 = vadd.f32 %v1206_v53, %v1136_v12  ;;  %v1588_v29 = vpop.f32.mrb[7].mxu1 }
0x1191   :  { %v1211_v36 = vmul.f32 0.044715, %v1207_v26  ;;  %v1210_v39 = vmul.f32 0.5, %v1207_v26 }
0x1193   :  { %v1212_v37 = vmul.f32 %v1211_v36, %v1207_v26 }
0x1195   :  { %v1213_v30 = vmul.f32 %v1212_v37, %v1207_v26 }
0x1197   :  { %v1214_v31 = vadd.f32 %v1213_v30, %v1207_v26 }
0x1199   :  { %v1215_v34 = vmul.f32 0.7978846, %v1214_v31 }
0x119b   :  { %1704 = vtanh.f32 %v1215_v34 }
0x11a5   :  { %v1705_v35 = vpop.eup %1704 }
0x11a6   :  { %v1217_v40 = vadd.f32 1.0, %v1705_v35 }
0x11a8   :  { %v1218_v43 = vmul.f32 %v1217_v40, %v1210_v39 }
0x11aa   :  { %1220 = vrot.lane.b32.xlu1 %v1218_v43, %s1715_s23 }
0x121c   :  { %v1221_v46 = vpop.permute.xlu1 %1220 }
0x121d   :  { %v1223_v47 = vadd.f32 %v1221_v46, %v1020_v61 }
0x121f   :  { %1225 = vrot.lane.b32.xlu1 %v1223_v47, %s1712_s21  ;;  %v1232_v62 = vmul.f32 %v1223_v47, %v1223_v47 }
0x1223   :  { %1234 = vrot.lane.b32.xlu1 %v1232_v62, %s1712_s21 }
0x1247   :  { %380 = vadd.xlane.f32.xlu1 %v379_v0 }
0x1291   :  { %v1226_v45 = vpop.permute.xlu1 %1225 }
0x1292   :  { %v1228_v48 = vsel %vm169_vm4, %v1226_v45, 0.0 }
0x1293   :  { %1229 = vadd.xlane.f32.xlu0 %v1228_v48 }
0x1295   :  { %v1235_v49 = vpop.permute.xlu1 %1234 }
0x1296   :  { %v1237_v50 = vsel %vm169_vm4, %v1235_v49, 0.0 }
0x1297   :  { %1238 = vadd.xlane.f32.xlu0 %v1237_v50 }
0x12ad   :  { %1252 = vrot.lane.b32.xlu0 %v1250_v51, %s1715_s23 }
0x12b1   :  { %1261 = vrot.lane.b32.xlu0 %v1259_v52, %s1715_s23 }
0x12d4   :  { %v381_v54 = vpop.xlane.xlu1 %380 }
0x12d5   :  { %v382_v55 = vmul.f32 0.03125, %v381_v54 }
0x12d7   :  { %v388_v13 = vmul.f32 %v382_v55, %v382_v55  ;;  %v390_v11 = vsub.f32 %v1871_v32, %v382_v55 }
0x12d9   :  { %v389_v58 = vsub.f32 %v387_v57, %v388_v13 }
0x12db   :  { %v391_v59 = vadd.f32 1e-05, %v389_v58 }
0x12dd   :  { %1706 = vrsqrt.f32 %v391_v59 }
0x12e7   :  { %v1707_v10 = vpop.eup %1706 }
0x12e8   :  { %v393_v56 = vmul.f32 %v1707_v10, %v390_v11 }
0x12ea   :  { %v398_v17 = vmul.f32 %v397_v8, %v393_v56 }
0x12ec   :  { %v403_v18 = vadd.f32 %v402_v16, %v398_v17 }
0x1320   :  { %v1230_v28 = vpop.xlane.xlu0 %1229 }
0x1321   :  { %v1231_v3 = vmul.f32 0.03125, %v1230_v28 }
0x1323   :  { %v1241_v24 = vmul.f32 %v1231_v3, %v1231_v3  ;;  %v1243_v14 = vsub.f32 %v1223_v47, %v1231_v3 }
0x1324   :  { %v1239_v60 = vpop.xlane.xlu0 %1238 }
0x1325   :  { %v1240_v9 = vmul.f32 0.03125, %v1239_v60 }
0x1327   :  { %v1242_v7 = vsub.f32 %v1240_v9, %v1241_v24 }
0x1328   :  { %v1253_v4 = vpop.permute.xlu0 %1252 }
0x1329   :  { %v1244_v61 = vadd.f32 1e-05, %v1242_v7 }
0x132b   :  { %1708 = vrsqrt.f32 %v1244_v61 }
0x132c   :  { %v1262_v42 = vpop.permute.xlu0 %1261 }
0x1335   :  { %v1709_v15 = vpop.eup %1708 }
0x1336   :  { %v1246_v38 = vmul.f32 %v1709_v15, %v1243_v14 }
0x1338   :  { %v1255_v44 = vmul.f32 %v1253_v4, %v1246_v38 }
0x133a   :  { %v1264_v19 = vadd.f32 %v1262_v42, %v1255_v44 }
0x133c   :  { %v1265_v32 = vsel %vm61_vm2, %v403_v18, %v1264_v19 }
0x133d   :  { %v1266_v20 = vsel %vm85_vm3, %v1265_v32, 0.0 }
0x133e   :  { %v1268_v5 = vsel %vm1267_vm10, %v1266_v20, 0.0 }
0x133f   :  { %1269 = vst [vmem:[%s2087_s2] sm:$0xff] %v1268_v5 }

</bundles_post_ra>
